<compile_context>
chip_gen: v6e
topology: v6e:2x2x1
jax: 0.10.0
libtpu: 0.0.40
codegen_flags: <defaults>
</compile_context>

<pallas_src>
import math

import numpy as np
import jax
import jax.numpy as jnp
from jax.experimental import pallas as pl
from jax.experimental.pallas import tpu as pltpu

SQRT2 = math.sqrt(2.0)
INV_SQRT2 = 1.0 / SQRT2
_LANE = 128
_VMEM_LIMIT = 32 * 1024 * 1024

# Normalized blur from blur_kernel=[1,3,3,1] (symmetric, so upfirdn2d's flip is a no-op).
_BLUR_1D = (0.125, 0.375, 0.375, 0.125)                                  # [1,3,3,1] / 8
_BLUR_2D = np.outer(np.array(_BLUR_1D), np.array(_BLUR_1D)).astype(np.float32)  # sums to 1


def _round_up(v, m):
    return (v + m - 1) // m * m


# --------------------------------------------------------------------- kernel 1: conv1 (fused)


def _conv1_kernel(x0_ref, x1_ref, x2_ref, w_ref, b_ref, o_ref):
    """One output row of the 3x3 stride-1 conv, + bias + fused leaky relu.

    x{0,1,2}_ref: (1, 1, W+2, C1) bf16 -- rows r, r+1, r+2 of the pad-1 NHWC input.
    w_ref: (3, 3, C1, C1) bf16,  b_ref: (1, C1) f32,  o_ref: (1, 1, W, C1) bf16.
    """
    W = o_ref.shape[2]
    Co = o_ref.shape[3]
    acc = jnp.zeros((W, Co), jnp.float32)
    rows = (x0_ref, x1_ref, x2_ref)
    for dy in range(3):
        for dx in range(3):
            acc = acc + jnp.dot(rows[dy][0, 0, dx:dx + W, :], w_ref[dy, dx],
                                preferred_element_type=jnp.float32)
    y = acc + b_ref[...]
    o_ref[0, 0, :, :] = (jnp.where(y >= 0.0, y, 0.2 * y) * SQRT2).astype(o_ref.dtype)


def _conv1_call(xp, w, b):
    N, Hp, Wp, C1 = xp.shape
    H, W = Hp - 2, Wp - 2
    Co = w.shape[-1]

    def row_spec(j):
        return pl.BlockSpec((1, 1, Wp, C1), lambda n, r, j=j: (n, r + j, 0, 0))

    return pl.pallas_call(
        _conv1_kernel,
        out_shape=jax.ShapeDtypeStruct((N, H, W, Co), jnp.bfloat16),
        grid=(N, H),
        in_specs=[row_spec(0), row_spec(1), row_spec(2),
                  pl.BlockSpec((3, 3, C1, Co), lambda n, r: (0, 0, 0, 0)),
                  pl.BlockSpec((1, Co), lambda n, r: (0, 0))],
        out_specs=pl.BlockSpec((1, 1, W, Co), lambda n, r: (n, r, 0, 0)),
        compiler_params=pltpu.CompilerParams(
            dimension_semantics=("parallel", "parallel"),
            vmem_limit_bytes=_VMEM_LIMIT),
    )(xp, xp, xp, w, b)


# ------------------------------------------- kernel 2: blur + conv2 + skip + residual (fused)


def _conv2_skip_kernel(o1a_ref, o1b_ref, o1c_ref, xa_ref, xb_ref,
                       w2_ref, b2_ref, ws_ref, o_ref):
    """One final output row R: blur(out1,pad2)->3x3 s2 conv->bias/lrelu, plus
    blur(x,pad1) at even taps only -> 1x1 s2 conv, plus (out+skip)/sqrt(2).

    o1{a,b,c}_ref: (1, 2, 2*(Wo+2), C1) bf16 -- out1 pad-2, [even|odd] column halves,
                   row pairs (2R,2R+1), (2R+2,2R+3), (2R+4,2R+5).
    x{a,b}_ref:    (1, 2, 2*(Wo+1), C1) bf16 -- x pad-1, [even|odd] halves, rows 2R..2R+3.
    w2_ref: (3,3,C1,C2) bf16,  b2_ref: (1,C2) f32,  ws_ref: (C1,C2) bf16,  o_ref: (1,1,Wo,C2) f32.
    """
    f32 = jnp.float32
    bf16 = jnp.bfloat16
    Wo = o_ref.shape[2]
    C2 = o_ref.shape[3]
    WE = o1a_ref.shape[2] // 2          # Wo + 2  (even/odd half width, conv2 path)
    WS = xa_ref.shape[2] // 2           # Wo + 1  (skip path)
    K = _BLUR_1D

    # ---- conv2 path: separable 4x4 blur fed straight into the 3x3 stride-2 MXU dots.
    rE, rO = [], []
    for ref in (o1a_ref, o1b_ref, o1c_ref):
        for k in range(2):
            rE.append(ref[0, k, 0:WE, :].astype(f32))
            rO.append(ref[0, k, WE:2 * WE, :].astype(f32))

    acc = jnp.zeros((Wo, C2), f32)
    for dy in range(3):
        # vertical blur of out1(pad2) rows 2R+dy .. 2R+dy+3, per column-parity phase
        vE = K[0] * rE[dy] + K[1] * rE[dy + 1] + K[2] * rE[dy + 2] + K[3] * rE[dy + 3]
        vO = K[0] * rO[dy] + K[1] * rO[dy + 1] + K[2] * rO[dy + 2] + K[3] * rO[dy + 3]
        # horizontal blur; splitting by output-column parity makes stride-2 taps contiguous
        bE = K[0] * vE[0:Wo + 1] + K[1] * vO[0:Wo + 1] + K[2] * vE[1:Wo + 2] + K[3] * vO[1:Wo + 2]
        bO = K[0] * vO[0:Wo] + K[1] * vE[1:Wo + 1] + K[2] * vO[1:Wo + 1] + K[3] * vE[2:Wo + 2]
        taps = (bE[0:Wo], bO, bE[1:Wo + 1])           # blurred columns 2S, 2S+1, 2S+2
        for dx in range(3):
            acc = acc + jnp.dot(taps[dx].astype(bf16), w2_ref[dy, dx],
                                preferred_element_type=f32)
    y = acc + b2_ref[...]
    y = jnp.where(y >= 0.0, y, 0.2 * y) * SQRT2

    # ---- skip path: blur(x, pad 1) evaluated ONLY at even rows/cols (decimation fused), 1x1 conv.
    xE, xO = [], []
    for ref in (xa_ref, xb_ref):
        for k in range(2):
            xE.append(ref[0, k, 0:WS, :].astype(f32))
            xO.append(ref[0, k, WS:2 * WS, :].astype(f32))
    vsE = K[0] * xE[0] + K[1] * xE[1] + K[2] * xE[2] + K[3] * xE[3]
    vsO = K[0] * xO[0] + K[1] * xO[1] + K[2] * xO[2] + K[3] * xO[3]
    sE = K[0] * vsE[0:Wo] + K[1] * vsO[0:Wo] + K[2] * vsE[1:Wo + 1] + K[3] * vsO[1:Wo + 1]
    skip = jnp.dot(sE.astype(bf16), ws_ref[...], preferred_element_type=f32)

    o_ref[0, 0, :, :] = ((y + skip) * INV_SQRT2).astype(o_ref.dtype)


def _conv2_skip_call(o1eo, xeo, w2, b2, ws):
    N, H4, W2e, C1 = o1eo.shape         # H4 = H+4, W2e = 2*(Wo+2)
    Ho = (H4 - 4) // 2
    Wo = W2e // 2 - 2
    W1e = xeo.shape[2]                  # 2*(Wo+1)
    C2 = w2.shape[-1]

    def o1_spec(j):
        return pl.BlockSpec((1, 2, W2e, C1), lambda n, R, j=j: (n, R + j, 0, 0))

    def x_spec(j):
        return pl.BlockSpec((1, 2, W1e, C1), lambda n, R, j=j: (n, R + j, 0, 0))

    return pl.pallas_call(
        _conv2_skip_kernel,
        out_shape=jax.ShapeDtypeStruct((N, Ho, Wo, C2), jnp.float32),
        grid=(N, Ho),
        in_specs=[o1_spec(0), o1_spec(1), o1_spec(2), x_spec(0), x_spec(1),
                  pl.BlockSpec((3, 3, C1, C2), lambda n, R: (0, 0, 0, 0)),
                  pl.BlockSpec((1, C2), lambda n, R: (0, 0)),
                  pl.BlockSpec((C1, C2), lambda n, R: (0, 0))],
        out_specs=pl.BlockSpec((1, 1, Wo, C2), lambda n, R: (n, R, 0, 0)),
        compiler_params=pltpu.CompilerParams(
            dimension_semantics=("parallel", "parallel"),
            vmem_limit_bytes=_VMEM_LIMIT),
    )(o1eo, o1eo, o1eo, xeo, xeo, w2, b2, ws)


# ----------------------------------------------------------------------------- forward (glue)


def resblock_forward(x_nchw, params):
    """ResBlock forward.  x_nchw: (N, Cin, H, W) f32 -> (N, Cout, H//2, W//2) f32."""
    w1, b1, w2, b2, ws = params
    N, Cin, H, W = x_nchw.shape
    Cout = w2.shape[0]
    if H % 2 or W % 2:
        raise ValueError("ResBlock downsample path requires even H, W")
    C1 = _round_up(Cin, _LANE)
    C2 = _round_up(Cout, _LANE)

    # EqualConv2d weight scaling (1/sqrt(fan_in)); pad channels to lane-dense 128s; bf16 for MXU.
    s1 = 1.0 / math.sqrt(Cin * 9)
    s2 = 1.0 / math.sqrt(Cin * 9)
    ss = 1.0 / math.sqrt(Cin)
    w1m = jnp.pad((w1 * s1).transpose(2, 3, 1, 0),
                  ((0, 0), (0, 0), (0, C1 - Cin), (0, C1 - Cin))).astype(jnp.bfloat16)
    w2m = jnp.pad((w2 * s2).transpose(2, 3, 1, 0),
                  ((0, 0), (0, 0), (0, C1 - Cin), (0, C2 - Cout))).astype(jnp.bfloat16)
    wsm = jnp.pad((ws * ss)[:, :, 0, 0].T,
                  ((0, C1 - Cin), (0, C2 - Cout))).astype(jnp.bfloat16)
    b1p = jnp.pad(b1, (0, C1 - Cin)).reshape(1, C1).astype(jnp.float32)
    b2p = jnp.pad(b2, (0, C2 - Cout)).reshape(1, C2).astype(jnp.float32)

    # NHWC, channel-padded, bf16; spatial pad 1 is shared by conv1 and the skip-path blur.
    x = jnp.transpose(x_nchw, (0, 2, 3, 1))
    x = jnp.pad(x, ((0, 0), (0, 0), (0, 0), (0, C1 - Cin))).astype(jnp.bfloat16)
    xp = jnp.pad(x, ((0, 0), (1, 1), (1, 1), (0, 0)))                  # (N, H+2, W+2, C1)

    # conv1: 3x3 stride 1 pad 1 + FusedLeakyReLU (fused, no im2col).
    out1 = _conv1_call(xp, w1m, b1p)                                   # (N, H, W, C1) bf16

    # Layout plumbing for the fused conv2/skip kernel: pad-2 + even/odd column split so the
    # stride-2 decimation inside the kernel becomes contiguous slices.
    o1p = jnp.pad(out1, ((0, 0), (2, 2), (2, 2), (0, 0)))              # (N, H+4, W+4, C1)
    o1eo = jnp.concatenate((o1p[:, :, 0::2, :], o1p[:, :, 1::2, :]), axis=2)
    xeo = jnp.concatenate((xp[:, :, 0::2, :], xp[:, :, 1::2, :]), axis=2)

    out = _conv2_skip_call(o1eo, xeo, w2m, b2p, wsm)                   # (N, H//2, W//2, C2) f32
    return jnp.transpose(out[:, :, :, :Cout], (0, 3, 1, 2))            # back to NCHW


# ----------------------------------------------------------------------------- pure-JAX reference


def ref_resblock(x, w1, b1, w2, b2, ws):
    Cin = x.shape[1]
    hp = jax.lax.Precision.HIGHEST

    def conv(inp, w, scale, stride, pad):
        return jax.lax.conv_general_dilated(
            inp, w * scale, (stride, stride), [(pad, pad), (pad, pad)],
            dimension_numbers=("NCHW", "OIHW", "NCHW"), precision=hp)

    def flrelu(inp, b):
        y = inp + b.reshape(1, -1, 1, 1)
        return jnp.where(y >= 0, y, 0.2 * y) * SQRT2

    def blur(inp, pad):
        C = inp.shape[1]
        k = jnp.tile(jnp.asarray(_BLUR_2D).reshape(1, 1, 4, 4), (C, 1, 1, 1))
        return jax.lax.conv_general_dilated(
            inp, k, (1, 1), [(pad, pad), (pad, pad)],
            dimension_numbers=("NCHW", "OIHW", "NCHW"),
            feature_group_count=C, precision=hp)

    s1 = 1.0 / math.sqrt(Cin * 9)
    s2 = 1.0 / math.sqrt(Cin * 9)
    ss = 1.0 / math.sqrt(Cin)
    out = flrelu(conv(x, w1, s1, 1, 1), b1)
    out = flrelu(conv(blur(out, 2), w2, s2, 2, 0), b2)
    skip = conv(blur(x, 1), ws, ss, 2, 0)
    return (out + skip) / SQRT2


# ----------------------------------------------------------------------------- main


if __name__ == "__main__":
    N, Cin, Cout, H, W = 2, 4, 8, 16, 16

    key = jax.random.PRNGKey(0)
    k1, k2, k3, k4, k5, kx = jax.random.split(key, 6)
    # EqualConv2d weights ~ randn (OIHW); FusedLeakyReLU biases made non-zero to exercise that path.
    w1 = jax.random.normal(k1, (Cin, Cin, 3, 3), jnp.float32)
    b1 = jax.random.normal(k2, (Cin,), jnp.float32) * 0.1
    w2 = jax.random.normal(k3, (Cout, Cin, 3, 3), jnp.float32)
    b2 = jax.random.normal(k4, (Cout,), jnp.float32) * 0.1
    ws = jax.random.normal(k5, (Cout, Cin, 1, 1), jnp.float32)
    x = jax.random.normal(kx, (N, Cin, H, W), jnp.float32)

    params = (w1, b1, w2, b2, ws)
    fwd = jax.jit(resblock_forward)

    out = jax.block_until_ready(fwd(x, params))
    assert out.shape == (N, Cout, H // 2, W // 2), out.shape

    ref = jax.block_until_ready(ref_resblock(x, w1, b1, w2, b2, ws))
    err = float(jnp.max(jnp.abs(out - ref)))
    # GEMM operands run in bf16 on the MXU (f32 accumulation); tolerance sized accordingly.
    if err > 1e-1:
        raise AssertionError(f"Pallas ResBlock mismatch vs reference: max abs err {err}")

    print("KERNEL_OK")
</pallas_src>

<mosaic_0001>
module attributes {stable_mosaic.version = 11 : i64} {
  func.func @_conv1_kernel(%arg0: i32, %arg1: i32, %arg2: memref<1x1x18x128xbf16, #tpu.memory_space<vmem>>, %arg3: memref<1x1x18x128xbf16, #tpu.memory_space<vmem>>, %arg4: memref<1x1x18x128xbf16, #tpu.memory_space<vmem>>, %arg5: memref<3x3x128x128xbf16, #tpu.memory_space<vmem>>, %arg6: memref<1x128xf32, #tpu.memory_space<vmem>>, %arg7: memref<1x1x16x128xbf16, #tpu.memory_space<vmem>>) attributes {dimension_semantics = [#tpu.dimension_semantics<parallel>, #tpu.dimension_semantics<parallel>], iteration_bounds = array<i64: 2, 16>, scalar_prefetch = 0 : i64, scratch_operands = 0 : i64, tpu.core_type = #tpu.core_type<tc>, window_params = [{transform_indices = @transform_0, window_bounds = array<i64: 1, 1, 18, 128>}, {transform_indices = @transform_1, window_bounds = array<i64: 1, 1, 18, 128>}, {transform_indices = @transform_2, window_bounds = array<i64: 1, 1, 18, 128>}, {pipeline_mode = #tpu.pipeline_mode<synchronous>, transform_indices = @transform_3, window_bounds = array<i64: 3, 3, 128, 128>}, {pipeline_mode = #tpu.pipeline_mode<synchronous>, transform_indices = @transform_4, window_bounds = array<i64: 1, 128>}, {transform_indices = @transform_5, window_bounds = array<i64: 1, 1, 16, 128>}]} {
    %cst = arith.constant 0.000000e+00 : f32
    %0 = vector.broadcast %cst : f32 to vector<16x128xf32>
    %c0 = arith.constant 0 : index
    %c0_0 = arith.constant 0 : index
    %c0_1 = arith.constant 0 : index
    %c0_2 = arith.constant 0 : index
    %1 = vector.load %arg2[%c0, %c0_0, %c0_1, %c0_2] : memref<1x1x18x128xbf16, #tpu.memory_space<vmem>>, vector<1x1x16x128xbf16>
    %2 = vector.shape_cast %1 : vector<1x1x16x128xbf16> to vector<16x128xbf16>
    %c0_3 = arith.constant 0 : index
    %c0_4 = arith.constant 0 : index
    %c0_5 = arith.constant 0 : index
    %c0_6 = arith.constant 0 : index
    %3 = vector.load %arg5[%c0_3, %c0_4, %c0_5, %c0_6] : memref<3x3x128x128xbf16, #tpu.memory_space<vmem>>, vector<1x1x128x128xbf16>
    %4 = vector.shape_cast %3 : vector<1x1x128x128xbf16> to vector<128x128xbf16>
    %cst_7 = arith.constant dense<0.000000e+00> : vector<16x128xf32>
    %5 = tpu.matmul %2, %4, %cst_7 {dimension_numbers = #tpu.dot_dimension_numbers<[1], [0], [0], [1], [0, 0, 1, 1], [], []>} : vector<16x128xbf16>, vector<128x128xbf16>, vector<16x128xf32> -> vector<16x128xf32>
    %6 = arith.addf %0, %5 : vector<16x128xf32>
    %c0_8 = arith.constant 0 : index
    %c0_9 = arith.constant 0 : index
    %c1 = arith.constant 1 : index
    %c0_10 = arith.constant 0 : index
    %7 = vector.load %arg2[%c0_8, %c0_9, %c1, %c0_10] : memref<1x1x18x128xbf16, #tpu.memory_space<vmem>>, vector<1x1x16x128xbf16>
    %8 = vector.shape_cast %7 : vector<1x1x16x128xbf16> to vector<16x128xbf16>
    %c0_11 = arith.constant 0 : index
    %c1_12 = arith.constant 1 : index
    %c0_13 = arith.constant 0 : index
    %c0_14 = arith.constant 0 : index
    %9 = vector.load %arg5[%c0_11, %c1_12, %c0_13, %c0_14] : memref<3x3x128x128xbf16, #tpu.memory_space<vmem>>, vector<1x1x128x128xbf16>
    %10 = vector.shape_cast %9 : vector<1x1x128x128xbf16> to vector<128x128xbf16>
    %cst_15 = arith.constant dense<0.000000e+00> : vector<16x128xf32>
    %11 = tpu.matmul %8, %10, %cst_15 {dimension_numbers = #tpu.dot_dimension_numbers<[1], [0], [0], [1], [0, 0, 1, 1], [], []>} : vector<16x128xbf16>, vector<128x128xbf16>, vector<16x128xf32> -> vector<16x128xf32>
    %12 = arith.addf %6, %11 : vector<16x128xf32>
    %c0_16 = arith.constant 0 : index
    %c0_17 = arith.constant 0 : index
    %c2 = arith.constant 2 : index
    %c0_18 = arith.constant 0 : index
    %13 = vector.load %arg2[%c0_16, %c0_17, %c2, %c0_18] : memref<1x1x18x128xbf16, #tpu.memory_space<vmem>>, vector<1x1x16x128xbf16>
    %14 = vector.shape_cast %13 : vector<1x1x16x128xbf16> to vector<16x128xbf16>
    %c0_19 = arith.constant 0 : index
    %c2_20 = arith.constant 2 : index
    %c0_21 = arith.constant 0 : index
    %c0_22 = arith.constant 0 : index
    %15 = vector.load %arg5[%c0_19, %c2_20, %c0_21, %c0_22] : memref<3x3x128x128xbf16, #tpu.memory_space<vmem>>, vector<1x1x128x128xbf16>
    %16 = vector.shape_cast %15 : vector<1x1x128x128xbf16> to vector<128x128xbf16>
    %cst_23 = arith.constant dense<0.000000e+00> : vector<16x128xf32>
    %17 = tpu.matmul %14, %16, %cst_23 {dimension_numbers = #tpu.dot_dimension_numbers<[1], [0], [0], [1], [0, 0, 1, 1], [], []>} : vector<16x128xbf16>, vector<128x128xbf16>, vector<16x128xf32> -> vector<16x128xf32>
    %18 = arith.addf %12, %17 : vector<16x128xf32>
    %c0_24 = arith.constant 0 : index
    %c0_25 = arith.constant 0 : index
    %c0_26 = arith.constant 0 : index
    %c0_27 = arith.constant 0 : index
    %19 = vector.load %arg3[%c0_24, %c0_25, %c0_26, %c0_27] : memref<1x1x18x128xbf16, #tpu.memory_space<vmem>>, vector<1x1x16x128xbf16>
    %20 = vector.shape_cast %19 : vector<1x1x16x128xbf16> to vector<16x128xbf16>
    %c1_28 = arith.constant 1 : index
    %c0_29 = arith.constant 0 : index
    %c0_30 = arith.constant 0 : index
    %c0_31 = arith.constant 0 : index
    %21 = vector.load %arg5[%c1_28, %c0_29, %c0_30, %c0_31] : memref<3x3x128x128xbf16, #tpu.memory_space<vmem>>, vector<1x1x128x128xbf16>
    %22 = vector.shape_cast %21 : vector<1x1x128x128xbf16> to vector<128x128xbf16>
    %cst_32 = arith.constant dense<0.000000e+00> : vector<16x128xf32>
    %23 = tpu.matmul %20, %22, %cst_32 {dimension_numbers = #tpu.dot_dimension_numbers<[1], [0], [0], [1], [0, 0, 1, 1], [], []>} : vector<16x128xbf16>, vector<128x128xbf16>, vector<16x128xf32> -> vector<16x128xf32>
    %24 = arith.addf %18, %23 : vector<16x128xf32>
    %c0_33 = arith.constant 0 : index
    %c0_34 = arith.constant 0 : index
    %c1_35 = arith.constant 1 : index
    %c0_36 = arith.constant 0 : index
    %25 = vector.load %arg3[%c0_33, %c0_34, %c1_35, %c0_36] : memref<1x1x18x128xbf16, #tpu.memory_space<vmem>>, vector<1x1x16x128xbf16>
    %26 = vector.shape_cast %25 : vector<1x1x16x128xbf16> to vector<16x128xbf16>
    %c1_37 = arith.constant 1 : index
    %c1_38 = arith.constant 1 : index
    %c0_39 = arith.constant 0 : index
    %c0_40 = arith.constant 0 : index
    %27 = vector.load %arg5[%c1_37, %c1_38, %c0_39, %c0_40] : memref<3x3x128x128xbf16, #tpu.memory_space<vmem>>, vector<1x1x128x128xbf16>
    %28 = vector.shape_cast %27 : vector<1x1x128x128xbf16> to vector<128x128xbf16>
    %cst_41 = arith.constant dense<0.000000e+00> : vector<16x128xf32>
    %29 = tpu.matmul %26, %28, %cst_41 {dimension_numbers = #tpu.dot_dimension_numbers<[1], [0], [0], [1], [0, 0, 1, 1], [], []>} : vector<16x128xbf16>, vector<128x128xbf16>, vector<16x128xf32> -> vector<16x128xf32>
    %30 = arith.addf %24, %29 : vector<16x128xf32>
    %c0_42 = arith.constant 0 : index
    %c0_43 = arith.constant 0 : index
    %c2_44 = arith.constant 2 : index
    %c0_45 = arith.constant 0 : index
    %31 = vector.load %arg3[%c0_42, %c0_43, %c2_44, %c0_45] : memref<1x1x18x128xbf16, #tpu.memory_space<vmem>>, vector<1x1x16x128xbf16>
    %32 = vector.shape_cast %31 : vector<1x1x16x128xbf16> to vector<16x128xbf16>
    %c1_46 = arith.constant 1 : index
    %c2_47 = arith.constant 2 : index
    %c0_48 = arith.constant 0 : index
    %c0_49 = arith.constant 0 : index
    %33 = vector.load %arg5[%c1_46, %c2_47, %c0_48, %c0_49] : memref<3x3x128x128xbf16, #tpu.memory_space<vmem>>, vector<1x1x128x128xbf16>
    %34 = vector.shape_cast %33 : vector<1x1x128x128xbf16> to vector<128x128xbf16>
    %cst_50 = arith.constant dense<0.000000e+00> : vector<16x128xf32>
    %35 = tpu.matmul %32, %34, %cst_50 {dimension_numbers = #tpu.dot_dimension_numbers<[1], [0], [0], [1], [0, 0, 1, 1], [], []>} : vector<16x128xbf16>, vector<128x128xbf16>, vector<16x128xf32> -> vector<16x128xf32>
    %36 = arith.addf %30, %35 : vector<16x128xf32>
    %c0_51 = arith.constant 0 : index
    %c0_52 = arith.constant 0 : index
    %c0_53 = arith.constant 0 : index
    %c0_54 = arith.constant 0 : index
    %37 = vector.load %arg4[%c0_51, %c0_52, %c0_53, %c0_54] : memref<1x1x18x128xbf16, #tpu.memory_space<vmem>>, vector<1x1x16x128xbf16>
    %38 = vector.shape_cast %37 : vector<1x1x16x128xbf16> to vector<16x128xbf16>
    %c2_55 = arith.constant 2 : index
    %c0_56 = arith.constant 0 : index
    %c0_57 = arith.constant 0 : index
    %c0_58 = arith.constant 0 : index
    %39 = vector.load %arg5[%c2_55, %c0_56, %c0_57, %c0_58] : memref<3x3x128x128xbf16, #tpu.memory_space<vmem>>, vector<1x1x128x128xbf16>
    %40 = vector.shape_cast %39 : vector<1x1x128x128xbf16> to vector<128x128xbf16>
    %cst_59 = arith.constant dense<0.000000e+00> : vector<16x128xf32>
    %41 = tpu.matmul %38, %40, %cst_59 {dimension_numbers = #tpu.dot_dimension_numbers<[1], [0], [0], [1], [0, 0, 1, 1], [], []>} : vector<16x128xbf16>, vector<128x128xbf16>, vector<16x128xf32> -> vector<16x128xf32>
    %42 = arith.addf %36, %41 : vector<16x128xf32>
    %c0_60 = arith.constant 0 : index
    %c0_61 = arith.constant 0 : index
    %c1_62 = arith.constant 1 : index
    %c0_63 = arith.constant 0 : index
    %43 = vector.load %arg4[%c0_60, %c0_61, %c1_62, %c0_63] : memref<1x1x18x128xbf16, #tpu.memory_space<vmem>>, vector<1x1x16x128xbf16>
    %44 = vector.shape_cast %43 : vector<1x1x16x128xbf16> to vector<16x128xbf16>
    %c2_64 = arith.constant 2 : index
    %c1_65 = arith.constant 1 : index
    %c0_66 = arith.constant 0 : index
    %c0_67 = arith.constant 0 : index
    %45 = vector.load %arg5[%c2_64, %c1_65, %c0_66, %c0_67] : memref<3x3x128x128xbf16, #tpu.memory_space<vmem>>, vector<1x1x128x128xbf16>
    %46 = vector.shape_cast %45 : vector<1x1x128x128xbf16> to vector<128x128xbf16>
    %cst_68 = arith.constant dense<0.000000e+00> : vector<16x128xf32>
    %47 = tpu.matmul %44, %46, %cst_68 {dimension_numbers = #tpu.dot_dimension_numbers<[1], [0], [0], [1], [0, 0, 1, 1], [], []>} : vector<16x128xbf16>, vector<128x128xbf16>, vector<16x128xf32> -> vector<16x128xf32>
    %48 = arith.addf %42, %47 : vector<16x128xf32>
    %c0_69 = arith.constant 0 : index
    %c0_70 = arith.constant 0 : index
    %c2_71 = arith.constant 2 : index
    %c0_72 = arith.constant 0 : index
    %49 = vector.load %arg4[%c0_69, %c0_70, %c2_71, %c0_72] : memref<1x1x18x128xbf16, #tpu.memory_space<vmem>>, vector<1x1x16x128xbf16>
    %50 = vector.shape_cast %49 : vector<1x1x16x128xbf16> to vector<16x128xbf16>
    %c2_73 = arith.constant 2 : index
    %c2_74 = arith.constant 2 : index
    %c0_75 = arith.constant 0 : index
    %c0_76 = arith.constant 0 : index
    %51 = vector.load %arg5[%c2_73, %c2_74, %c0_75, %c0_76] : memref<3x3x128x128xbf16, #tpu.memory_space<vmem>>, vector<1x1x128x128xbf16>
    %52 = vector.shape_cast %51 : vector<1x1x128x128xbf16> to vector<128x128xbf16>
    %cst_77 = arith.constant dense<0.000000e+00> : vector<16x128xf32>
    %53 = tpu.matmul %50, %52, %cst_77 {dimension_numbers = #tpu.dot_dimension_numbers<[1], [0], [0], [1], [0, 0, 1, 1], [], []>} : vector<16x128xbf16>, vector<128x128xbf16>, vector<16x128xf32> -> vector<16x128xf32>
    %54 = arith.addf %48, %53 : vector<16x128xf32>
    %c0_78 = arith.constant 0 : index
    %c0_79 = arith.constant 0 : index
    %55 = vector.load %arg6[%c0_78, %c0_79] : memref<1x128xf32, #tpu.memory_space<vmem>>, vector<1x128xf32>
    %56 = vector.broadcast %55 : vector<1x128xf32> to vector<16x128xf32>
    %57 = arith.addf %54, %56 : vector<16x128xf32>
    %cst_80 = arith.constant 0.000000e+00 : f32
    %58 = vector.broadcast %cst_80 : f32 to vector<16x128xf32>
    %59 = arith.cmpf oge, %57, %58 : vector<16x128xf32>
    %cst_81 = arith.constant 2.000000e-01 : f32
    %60 = vector.broadcast %cst_81 : f32 to vector<16x128xf32>
    %61 = arith.mulf %60, %57 : vector<16x128xf32>
    %62 = arith.select %59, %57, %61 : vector<16x128xi1>, vector<16x128xf32>
    %cst_82 = arith.constant 1.41421354 : f32
    %63 = vector.broadcast %cst_82 : f32 to vector<16x128xf32>
    %64 = arith.mulf %62, %63 : vector<16x128xf32>
    %65 = arith.truncf %64 : vector<16x128xf32> to vector<16x128xbf16>
    %c0_83 = arith.constant 0 : index
    %c0_84 = arith.constant 0 : index
    %c0_85 = arith.constant 0 : index
    %c0_86 = arith.constant 0 : index
    %66 = vector.load %arg7[%c0_83, %c0_84, %c0_85, %c0_86] : memref<1x1x16x128xbf16, #tpu.memory_space<vmem>>, vector<1x1x16x128xbf16>
    %67 = vector.shape_cast %66 : vector<1x1x16x128xbf16> to vector<16x128xbf16>
    %68 = vector.shape_cast %65 : vector<16x128xbf16> to vector<1x1x16x128xbf16>
    tpu.vector_store %arg7[%c0_83, %c0_84, %c0_85, %c0_86], %68 {strides = array<i32>} : memref<1x1x16x128xbf16, #tpu.memory_space<vmem>>, vector<1x1x16x128xbf16>,
    return
  }
  func.func @transform_0(%arg0: i32, %arg1: i32) -> (i32, i32, i32, i32) {
    %c0_i32 = arith.constant 0 : i32
    %0 = arith.addi %arg1, %c0_i32 : i32
    %c0_i32_0 = arith.constant 0 : i32
    %c0_i32_1 = arith.constant 0 : i32
    %c0_i32_2 = arith.constant 0 : i32
    return %arg0, %0, %c0_i32_0, %c0_i32_1 : i32, i32, i32, i32
  }
  func.func @transform_1(%arg0: i32, %arg1: i32) -> (i32, i32, i32, i32) {
    %c1_i32 = arith.constant 1 : i32
    %0 = arith.addi %arg1, %c1_i32 : i32
    %c0_i32 = arith.constant 0 : i32
    %c0_i32_0 = arith.constant 0 : i32
    %c0_i32_1 = arith.constant 0 : i32
    return %arg0, %0, %c0_i32, %c0_i32_0 : i32, i32, i32, i32
  }
  func.func @transform_2(%arg0: i32, %arg1: i32) -> (i32, i32, i32, i32) {
    %c2_i32 = arith.constant 2 : i32
    %0 = arith.addi %arg1, %c2_i32 : i32
    %c0_i32 = arith.constant 0 : i32
    %c0_i32_0 = arith.constant 0 : i32
    %c0_i32_1 = arith.constant 0 : i32
    return %arg0, %0, %c0_i32, %c0_i32_0 : i32, i32, i32, i32
  }
  func.func @transform_3(%arg0: i32, %arg1: i32) -> (i32, i32, i32, i32) {
    %c0_i32 = arith.constant 0 : i32
    %c0_i32_0 = arith.constant 0 : i32
    %c0_i32_1 = arith.constant 0 : i32
    %c0_i32_2 = arith.constant 0 : i32
    %c0_i32_3 = arith.constant 0 : i32
    return %c0_i32, %c0_i32_0, %c0_i32_1, %c0_i32_2 : i32, i32, i32, i32
  }
  func.func @transform_4(%arg0: i32, %arg1: i32) -> (i32, i32) {
    %c0_i32 = arith.constant 0 : i32
    %c0_i32_0 = arith.constant 0 : i32
    %c0_i32_1 = arith.constant 0 : i32
    return %c0_i32, %c0_i32_0 : i32, i32
  }
  func.func @transform_5(%arg0: i32, %arg1: i32) -> (i32, i32, i32, i32) {
    %c0_i32 = arith.constant 0 : i32
    %c0_i32_0 = arith.constant 0 : i32
    %c0_i32_1 = arith.constant 0 : i32
    return %arg0, %arg1, %c0_i32, %c0_i32_0 : i32, i32, i32, i32
  }
}

module attributes {stable_mosaic.version = 11 : i64} {
  func.func @_conv2_skip_kernel(%arg0: i32, %arg1: i32, %arg2: memref<1x2x20x128xbf16, #tpu.memory_space<vmem>>, %arg3: memref<1x2x20x128xbf16, #tpu.memory_space<vmem>>, %arg4: memref<1x2x20x128xbf16, #tpu.memory_space<vmem>>, %arg5: memref<1x2x18x128xbf16, #tpu.memory_space<vmem>>, %arg6: memref<1x2x18x128xbf16, #tpu.memory_space<vmem>>, %arg7: memref<3x3x128x128xbf16, #tpu.memory_space<vmem>>, %arg8: memref<1x128xf32, #tpu.memory_space<vmem>>, %arg9: memref<128x128xbf16, #tpu.memory_space<vmem>>, %arg10: memref<1x1x8x128xf32, #tpu.memory_space<vmem>>) attributes {dimension_semantics = [#tpu.dimension_semantics<parallel>, #tpu.dimension_semantics<parallel>], iteration_bounds = array<i64: 2, 8>, scalar_prefetch = 0 : i64, scratch_operands = 0 : i64, tpu.core_type = #tpu.core_type<tc>, window_params = [{transform_indices = @transform_0, window_bounds = array<i64: 1, 2, 20, 128>}, {transform_indices = @transform_1, window_bounds = array<i64: 1, 2, 20, 128>}, {transform_indices = @transform_2, window_bounds = array<i64: 1, 2, 20, 128>}, {transform_indices = @transform_3, window_bounds = array<i64: 1, 2, 18, 128>}, {transform_indices = @transform_4, window_bounds = array<i64: 1, 2, 18, 128>}, {pipeline_mode = #tpu.pipeline_mode<synchronous>, transform_indices = @transform_5, window_bounds = array<i64: 3, 3, 128, 128>}, {pipeline_mode = #tpu.pipeline_mode<synchronous>, transform_indices = @transform_6, window_bounds = array<i64: 1, 128>}, {pipeline_mode = #tpu.pipeline_mode<synchronous>, transform_indices = @transform_7, window_bounds = array<i64: 128, 128>}, {transform_indices = @transform_8, window_bounds = array<i64: 1, 1, 8, 128>}]} {
    %c0 = arith.constant 0 : index
    %c0_0 = arith.constant 0 : index
    %c0_1 = arith.constant 0 : index
    %c0_2 = arith.constant 0 : index
    %0 = vector.load %arg2[%c0, %c0_0, %c0_1, %c0_2] : memref<1x2x20x128xbf16, #tpu.memory_space<vmem>>, vector<1x1x10x128xbf16>
    %1 = vector.shape_cast %0 : vector<1x1x10x128xbf16> to vector<10x128xbf16>
    %2 = arith.extf %1 : vector<10x128xbf16> to vector<10x128xf32>
    %c0_3 = arith.constant 0 : index
    %c0_4 = arith.constant 0 : index
    %c10 = arith.constant 10 : index
    %c0_5 = arith.constant 0 : index
    %3 = vector.load %arg2[%c0_3, %c0_4, %c10, %c0_5] : memref<1x2x20x128xbf16, #tpu.memory_space<vmem>>, vector<1x1x10x128xbf16>
    %4 = vector.shape_cast %3 : vector<1x1x10x128xbf16> to vector<10x128xbf16>
    %5 = arith.extf %4 : vector<10x128xbf16> to vector<10x128xf32>
    %c0_6 = arith.constant 0 : index
    %c1 = arith.constant 1 : index
    %c0_7 = arith.constant 0 : index
    %c0_8 = arith.constant 0 : index
    %6 = vector.load %arg2[%c0_6, %c1, %c0_7, %c0_8] : memref<1x2x20x128xbf16, #tpu.memory_space<vmem>>, vector<1x1x10x128xbf16>
    %7 = vector.shape_cast %6 : vector<1x1x10x128xbf16> to vector<10x128xbf16>
    %8 = arith.extf %7 : vector<10x128xbf16> to vector<10x128xf32>
    %c0_9 = arith.constant 0 : index
    %c1_10 = arith.constant 1 : index
    %c10_11 = arith.constant 10 : index
    %c0_12 = arith.constant 0 : index
    %9 = vector.load %arg2[%c0_9, %c1_10, %c10_11, %c0_12] : memref<1x2x20x128xbf16, #tpu.memory_space<vmem>>, vector<1x1x10x128xbf16>
    %10 = vector.shape_cast %9 : vector<1x1x10x128xbf16> to vector<10x128xbf16>
    %11 = arith.extf %10 : vector<10x128xbf16> to vector<10x128xf32>
    %c0_13 = arith.constant 0 : index
    %c0_14 = arith.constant 0 : index
    %c0_15 = arith.constant 0 : index
    %c0_16 = arith.constant 0 : index
    %12 = vector.load %arg3[%c0_13, %c0_14, %c0_15, %c0_16] : memref<1x2x20x128xbf16, #tpu.memory_space<vmem>>, vector<1x1x10x128xbf16>
    %13 = vector.shape_cast %12 : vector<1x1x10x128xbf16> to vector<10x128xbf16>
    %14 = arith.extf %13 : vector<10x128xbf16> to vector<10x128xf32>
    %c0_17 = arith.constant 0 : index
    %c0_18 = arith.constant 0 : index
    %c10_19 = arith.constant 10 : index
    %c0_20 = arith.constant 0 : index
    %15 = vector.load %arg3[%c0_17, %c0_18, %c10_19, %c0_20] : memref<1x2x20x128xbf16, #tpu.memory_space<vmem>>, vector<1x1x10x128xbf16>
    %16 = vector.shape_cast %15 : vector<1x1x10x128xbf16> to vector<10x128xbf16>
    %17 = arith.extf %16 : vector<10x128xbf16> to vector<10x128xf32>
    %c0_21 = arith.constant 0 : index
    %c1_22 = arith.constant 1 : index
    %c0_23 = arith.constant 0 : index
    %c0_24 = arith.constant 0 : index
    %18 = vector.load %arg3[%c0_21, %c1_22, %c0_23, %c0_24] : memref<1x2x20x128xbf16, #tpu.memory_space<vmem>>, vector<1x1x10x128xbf16>
    %19 = vector.shape_cast %18 : vector<1x1x10x128xbf16> to vector<10x128xbf16>
    %20 = arith.extf %19 : vector<10x128xbf16> to vector<10x128xf32>
    %c0_25 = arith.constant 0 : index
    %c1_26 = arith.constant 1 : index
    %c10_27 = arith.constant 10 : index
    %c0_28 = arith.constant 0 : index
    %21 = vector.load %arg3[%c0_25, %c1_26, %c10_27, %c0_28] : memref<1x2x20x128xbf16, #tpu.memory_space<vmem>>, vector<1x1x10x128xbf16>
    %22 = vector.shape_cast %21 : vector<1x1x10x128xbf16> to vector<10x128xbf16>
    %23 = arith.extf %22 : vector<10x128xbf16> to vector<10x128xf32>
    %c0_29 = arith.constant 0 : index
    %c0_30 = arith.constant 0 : index
    %c0_31 = arith.constant 0 : index
    %c0_32 = arith.constant 0 : index
    %24 = vector.load %arg4[%c0_29, %c0_30, %c0_31, %c0_32] : memref<1x2x20x128xbf16, #tpu.memory_space<vmem>>, vector<1x1x10x128xbf16>
    %25 = vector.shape_cast %24 : vector<1x1x10x128xbf16> to vector<10x128xbf16>
    %26 = arith.extf %25 : vector<10x128xbf16> to vector<10x128xf32>
    %c0_33 = arith.constant 0 : index
    %c0_34 = arith.constant 0 : index
    %c10_35 = arith.constant 10 : index
    %c0_36 = arith.constant 0 : index
    %27 = vector.load %arg4[%c0_33, %c0_34, %c10_35, %c0_36] : memref<1x2x20x128xbf16, #tpu.memory_space<vmem>>, vector<1x1x10x128xbf16>
    %28 = vector.shape_cast %27 : vector<1x1x10x128xbf16> to vector<10x128xbf16>
    %29 = arith.extf %28 : vector<10x128xbf16> to vector<10x128xf32>
    %c0_37 = arith.constant 0 : index
    %c1_38 = arith.constant 1 : index
    %c0_39 = arith.constant 0 : index
    %c0_40 = arith.constant 0 : index
    %30 = vector.load %arg4[%c0_37, %c1_38, %c0_39, %c0_40] : memref<1x2x20x128xbf16, #tpu.memory_space<vmem>>, vector<1x1x10x128xbf16>
    %31 = vector.shape_cast %30 : vector<1x1x10x128xbf16> to vector<10x128xbf16>
    %32 = arith.extf %31 : vector<10x128xbf16> to vector<10x128xf32>
    %c0_41 = arith.constant 0 : index
    %c1_42 = arith.constant 1 : index
    %c10_43 = arith.constant 10 : index
    %c0_44 = arith.constant 0 : index
    %33 = vector.load %arg4[%c0_41, %c1_42, %c10_43, %c0_44] : memref<1x2x20x128xbf16, #tpu.memory_space<vmem>>, vector<1x1x10x128xbf16>
    %34 = vector.shape_cast %33 : vector<1x1x10x128xbf16> to vector<10x128xbf16>
    %35 = arith.extf %34 : vector<10x128xbf16> to vector<10x128xf32>
    %cst = arith.constant 0.000000e+00 : f32
    %36 = vector.broadcast %cst : f32 to vector<8x128xf32>
    %cst_45 = arith.constant 1.250000e-01 : f32
    %37 = vector.broadcast %cst_45 : f32 to vector<10x128xf32>
    %38 = arith.mulf %37, %2 : vector<10x128xf32>
    %cst_46 = arith.constant 3.750000e-01 : f32
    %39 = vector.broadcast %cst_46 : f32 to vector<10x128xf32>
    %40 = arith.mulf %39, %8 : vector<10x128xf32>
    %41 = arith.addf %38, %40 : vector<10x128xf32>
    %cst_47 = arith.constant 3.750000e-01 : f32
    %42 = vector.broadcast %cst_47 : f32 to vector<10x128xf32>
    %43 = arith.mulf %42, %14 : vector<10x128xf32>
    %44 = arith.addf %41, %43 : vector<10x128xf32>
    %cst_48 = arith.constant 1.250000e-01 : f32
    %45 = vector.broadcast %cst_48 : f32 to vector<10x128xf32>
    %46 = arith.mulf %45, %20 : vector<10x128xf32>
    %47 = arith.addf %44, %46 : vector<10x128xf32>
    %cst_49 = arith.constant 1.250000e-01 : f32
    %48 = vector.broadcast %cst_49 : f32 to vector<10x128xf32>
    %49 = arith.mulf %48, %5 : vector<10x128xf32>
    %cst_50 = arith.constant 3.750000e-01 : f32
    %50 = vector.broadcast %cst_50 : f32 to vector<10x128xf32>
    %51 = arith.mulf %50, %11 : vector<10x128xf32>
    %52 = arith.addf %49, %51 : vector<10x128xf32>
    %cst_51 = arith.constant 3.750000e-01 : f32
    %53 = vector.broadcast %cst_51 : f32 to vector<10x128xf32>
    %54 = arith.mulf %53, %17 : vector<10x128xf32>
    %55 = arith.addf %52, %54 : vector<10x128xf32>
    %cst_52 = arith.constant 1.250000e-01 : f32
    %56 = vector.broadcast %cst_52 : f32 to vector<10x128xf32>
    %57 = arith.mulf %56, %23 : vector<10x128xf32>
    %58 = arith.addf %55, %57 : vector<10x128xf32>
    %59 = vector.extract_strided_slice %47 {offsets = [0, 0], sizes = [9, 128], strides = [1, 1]} : vector<10x128xf32> to vector<9x128xf32>
    %cst_53 = arith.constant 1.250000e-01 : f32
    %60 = vector.broadcast %cst_53 : f32 to vector<9x128xf32>
    %61 = arith.mulf %60, %59 : vector<9x128xf32>
    %62 = vector.extract_strided_slice %58 {offsets = [0, 0], sizes = [9, 128], strides = [1, 1]} : vector<10x128xf32> to vector<9x128xf32>
    %cst_54 = arith.constant 3.750000e-01 : f32
    %63 = vector.broadcast %cst_54 : f32 to vector<9x128xf32>
    %64 = arith.mulf %63, %62 : vector<9x128xf32>
    %65 = arith.addf %61, %64 : vector<9x128xf32>
    %66 = vector.extract_strided_slice %47 {offsets = [1, 0], sizes = [9, 128], strides = [1, 1]} : vector<10x128xf32> to vector<9x128xf32>
    %cst_55 = arith.constant 3.750000e-01 : f32
    %67 = vector.broadcast %cst_55 : f32 to vector<9x128xf32>
    %68 = arith.mulf %67, %66 : vector<9x128xf32>
    %69 = arith.addf %65, %68 : vector<9x128xf32>
    %70 = vector.extract_strided_slice %58 {offsets = [1, 0], sizes = [9, 128], strides = [1, 1]} : vector<10x128xf32> to vector<9x128xf32>
    %cst_56 = arith.constant 1.250000e-01 : f32
    %71 = vector.broadcast %cst_56 : f32 to vector<9x128xf32>
    %72 = arith.mulf %71, %70 : vector<9x128xf32>
    %73 = arith.addf %69, %72 : vector<9x128xf32>
    %74 = vector.extract_strided_slice %58 {offsets = [0, 0], sizes = [8, 128], strides = [1, 1]} : vector<10x128xf32> to vector<8x128xf32>
    %cst_57 = arith.constant 1.250000e-01 : f32
    %75 = vector.broadcast %cst_57 : f32 to vector<8x128xf32>
    %76 = arith.mulf %75, %74 : vector<8x128xf32>
    %77 = vector.extract_strided_slice %47 {offsets = [1, 0], sizes = [8, 128], strides = [1, 1]} : vector<10x128xf32> to vector<8x128xf32>
    %cst_58 = arith.constant 3.750000e-01 : f32
    %78 = vector.broadcast %cst_58 : f32 to vector<8x128xf32>
    %79 = arith.mulf %78, %77 : vector<8x128xf32>
    %80 = arith.addf %76, %79 : vector<8x128xf32>
    %81 = vector.extract_strided_slice %58 {offsets = [1, 0], sizes = [8, 128], strides = [1, 1]} : vector<10x128xf32> to vector<8x128xf32>
    %cst_59 = arith.constant 3.750000e-01 : f32
    %82 = vector.broadcast %cst_59 : f32 to vector<8x128xf32>
    %83 = arith.mulf %82, %81 : vector<8x128xf32>
    %84 = arith.addf %80, %83 : vector<8x128xf32>
    %85 = vector.extract_strided_slice %47 {offsets = [2, 0], sizes = [8, 128], strides = [1, 1]} : vector<10x128xf32> to vector<8x128xf32>
    %cst_60 = arith.constant 1.250000e-01 : f32
    %86 = vector.broadcast %cst_60 : f32 to vector<8x128xf32>
    %87 = arith.mulf %86, %85 : vector<8x128xf32>
    %88 = arith.addf %84, %87 : vector<8x128xf32>
    %89 = vector.extract_strided_slice %73 {offsets = [0, 0], sizes = [8, 128], strides = [1, 1]} : vector<9x128xf32> to vector<8x128xf32>
    %90 = vector.extract_strided_slice %73 {offsets = [1, 0], sizes = [8, 128], strides = [1, 1]} : vector<9x128xf32> to vector<8x128xf32>
    %91 = arith.truncf %89 : vector<8x128xf32> to vector<8x128xbf16>
    %c0_61 = arith.constant 0 : index
    %c0_62 = arith.constant 0 : index
    %c0_63 = arith.constant 0 : index
    %c0_64 = arith.constant 0 : index
    %92 = vector.load %arg7[%c0_61, %c0_62, %c0_63, %c0_64] : memref<3x3x128x128xbf16, #tpu.memory_space<vmem>>, vector<1x1x128x128xbf16>
    %93 = vector.shape_cast %92 : vector<1x1x128x128xbf16> to vector<128x128xbf16>
    %cst_65 = arith.constant dense<0.000000e+00> : vector<8x128xf32>
    %94 = tpu.matmul %91, %93, %cst_65 {dimension_numbers = #tpu.dot_dimension_numbers<[1], [0], [0], [1], [0, 0, 1, 1], [], []>} : vector<8x128xbf16>, vector<128x128xbf16>, vector<8x128xf32> -> vector<8x128xf32>
    %95 = arith.addf %36, %94 : vector<8x128xf32>
    %96 = arith.truncf %88 : vector<8x128xf32> to vector<8x128xbf16>
    %c0_66 = arith.constant 0 : index
    %c1_67 = arith.constant 1 : index
    %c0_68 = arith.constant 0 : index
    %c0_69 = arith.constant 0 : index
    %97 = vector.load %arg7[%c0_66, %c1_67, %c0_68, %c0_69] : memref<3x3x128x128xbf16, #tpu.memory_space<vmem>>, vector<1x1x128x128xbf16>
    %98 = vector.shape_cast %97 : vector<1x1x128x128xbf16> to vector<128x128xbf16>
    %cst_70 = arith.constant dense<0.000000e+00> : vector<8x128xf32>
    %99 = tpu.matmul %96, %98, %cst_70 {dimension_numbers = #tpu.dot_dimension_numbers<[1], [0], [0], [1], [0, 0, 1, 1], [], []>} : vector<8x128xbf16>, vector<128x128xbf16>, vector<8x128xf32> -> vector<8x128xf32>
    %100 = arith.addf %95, %99 : vector<8x128xf32>
    %101 = arith.truncf %90 : vector<8x128xf32> to vector<8x128xbf16>
    %c0_71 = arith.constant 0 : index
    %c2 = arith.constant 2 : index
    %c0_72 = arith.constant 0 : index
    %c0_73 = arith.constant 0 : index
    %102 = vector.load %arg7[%c0_71, %c2, %c0_72, %c0_73] : memref<3x3x128x128xbf16, #tpu.memory_space<vmem>>, vector<1x1x128x128xbf16>
    %103 = vector.shape_cast %102 : vector<1x1x128x128xbf16> to vector<128x128xbf16>
    %cst_74 = arith.constant dense<0.000000e+00> : vector<8x128xf32>
    %104 = tpu.matmul %101, %103, %cst_74 {dimension_numbers = #tpu.dot_dimension_numbers<[1], [0], [0], [1], [0, 0, 1, 1], [], []>} : vector<8x128xbf16>, vector<128x128xbf16>, vector<8x128xf32> -> vector<8x128xf32>
    %105 = arith.addf %100, %104 : vector<8x128xf32>
    %cst_75 = arith.constant 1.250000e-01 : f32
    %106 = vector.broadcast %cst_75 : f32 to vector<10x128xf32>
    %107 = arith.mulf %106, %8 : vector<10x128xf32>
    %cst_76 = arith.constant 3.750000e-01 : f32
    %108 = vector.broadcast %cst_76 : f32 to vector<10x128xf32>
    %109 = arith.mulf %108, %14 : vector<10x128xf32>
    %110 = arith.addf %107, %109 : vector<10x128xf32>
    %cst_77 = arith.constant 3.750000e-01 : f32
    %111 = vector.broadcast %cst_77 : f32 to vector<10x128xf32>
    %112 = arith.mulf %111, %20 : vector<10x128xf32>
    %113 = arith.addf %110, %112 : vector<10x128xf32>
    %cst_78 = arith.constant 1.250000e-01 : f32
    %114 = vector.broadcast %cst_78 : f32 to vector<10x128xf32>
    %115 = arith.mulf %114, %26 : vector<10x128xf32>
    %116 = arith.addf %113, %115 : vector<10x128xf32>
    %cst_79 = arith.constant 1.250000e-01 : f32
    %117 = vector.broadcast %cst_79 : f32 to vector<10x128xf32>
    %118 = arith.mulf %117, %11 : vector<10x128xf32>
    %cst_80 = arith.constant 3.750000e-01 : f32
    %119 = vector.broadcast %cst_80 : f32 to vector<10x128xf32>
    %120 = arith.mulf %119, %17 : vector<10x128xf32>
    %121 = arith.addf %118, %120 : vector<10x128xf32>
    %cst_81 = arith.constant 3.750000e-01 : f32
    %122 = vector.broadcast %cst_81 : f32 to vector<10x128xf32>
    %123 = arith.mulf %122, %23 : vector<10x128xf32>
    %124 = arith.addf %121, %123 : vector<10x128xf32>
    %cst_82 = arith.constant 1.250000e-01 : f32
    %125 = vector.broadcast %cst_82 : f32 to vector<10x128xf32>
    %126 = arith.mulf %125, %29 : vector<10x128xf32>
    %127 = arith.addf %124, %126 : vector<10x128xf32>
    %128 = vector.extract_strided_slice %116 {offsets = [0, 0], sizes = [9, 128], strides = [1, 1]} : vector<10x128xf32> to vector<9x128xf32>
    %cst_83 = arith.constant 1.250000e-01 : f32
    %129 = vector.broadcast %cst_83 : f32 to vector<9x128xf32>
    %130 = arith.mulf %129, %128 : vector<9x128xf32>
    %131 = vector.extract_strided_slice %127 {offsets = [0, 0], sizes = [9, 128], strides = [1, 1]} : vector<10x128xf32> to vector<9x128xf32>
    %cst_84 = arith.constant 3.750000e-01 : f32
    %132 = vector.broadcast %cst_84 : f32 to vector<9x128xf32>
    %133 = arith.mulf %132, %131 : vector<9x128xf32>
    %134 = arith.addf %130, %133 : vector<9x128xf32>
    %135 = vector.extract_strided_slice %116 {offsets = [1, 0], sizes = [9, 128], strides = [1, 1]} : vector<10x128xf32> to vector<9x128xf32>
    %cst_85 = arith.constant 3.750000e-01 : f32
    %136 = vector.broadcast %cst_85 : f32 to vector<9x128xf32>
    %137 = arith.mulf %136, %135 : vector<9x128xf32>
    %138 = arith.addf %134, %137 : vector<9x128xf32>
    %139 = vector.extract_strided_slice %127 {offsets = [1, 0], sizes = [9, 128], strides = [1, 1]} : vector<10x128xf32> to vector<9x128xf32>
    %cst_86 = arith.constant 1.250000e-01 : f32
    %140 = vector.broadcast %cst_86 : f32 to vector<9x128xf32>
    %141 = arith.mulf %140, %139 : vector<9x128xf32>
    %142 = arith.addf %138, %141 : vector<9x128xf32>
    %143 = vector.extract_strided_slice %127 {offsets = [0, 0], sizes = [8, 128], strides = [1, 1]} : vector<10x128xf32> to vector<8x128xf32>
    %cst_87 = arith.constant 1.250000e-01 : f32
    %144 = vector.broadcast %cst_87 : f32 to vector<8x128xf32>
    %145 = arith.mulf %144, %143 : vector<8x128xf32>
    %146 = vector.extract_strided_slice %116 {offsets = [1, 0], sizes = [8, 128], strides = [1, 1]} : vector<10x128xf32> to vector<8x128xf32>
    %cst_88 = arith.constant 3.750000e-01 : f32
    %147 = vector.broadcast %cst_88 : f32 to vector<8x128xf32>
    %148 = arith.mulf %147, %146 : vector<8x128xf32>
    %149 = arith.addf %145, %148 : vector<8x128xf32>
    %150 = vector.extract_strided_slice %127 {offsets = [1, 0], sizes = [8, 128], strides = [1, 1]} : vector<10x128xf32> to vector<8x128xf32>
    %cst_89 = arith.constant 3.750000e-01 : f32
    %151 = vector.broadcast %cst_89 : f32 to vector<8x128xf32>
    %152 = arith.mulf %151, %150 : vector<8x128xf32>
    %153 = arith.addf %149, %152 : vector<8x128xf32>
    %154 = vector.extract_strided_slice %116 {offsets = [2, 0], sizes = [8, 128], strides = [1, 1]} : vector<10x128xf32> to vector<8x128xf32>
    %cst_90 = arith.constant 1.250000e-01 : f32
    %155 = vector.broadcast %cst_90 : f32 to vector<8x128xf32>
    %156 = arith.mulf %155, %154 : vector<8x128xf32>
    %157 = arith.addf %153, %156 : vector<8x128xf32>
    %158 = vector.extract_strided_slice %142 {offsets = [0, 0], sizes = [8, 128], strides = [1, 1]} : vector<9x128xf32> to vector<8x128xf32>
    %159 = vector.extract_strided_slice %142 {offsets = [1, 0], sizes = [8, 128], strides = [1, 1]} : vector<9x128xf32> to vector<8x128xf32>
    %160 = arith.truncf %158 : vector<8x128xf32> to vector<8x128xbf16>
    %c1_91 = arith.constant 1 : index
    %c0_92 = arith.constant 0 : index
    %c0_93 = arith.constant 0 : index
    %c0_94 = arith.constant 0 : index
    %161 = vector.load %arg7[%c1_91, %c0_92, %c0_93, %c0_94] : memref<3x3x128x128xbf16, #tpu.memory_space<vmem>>, vector<1x1x128x128xbf16>
    %162 = vector.shape_cast %161 : vector<1x1x128x128xbf16> to vector<128x128xbf16>
    %cst_95 = arith.constant dense<0.000000e+00> : vector<8x128xf32>
    %163 = tpu.matmul %160, %162, %cst_95 {dimension_numbers = #tpu.dot_dimension_numbers<[1], [0], [0], [1], [0, 0, 1, 1], [], []>} : vector<8x128xbf16>, vector<128x128xbf16>, vector<8x128xf32> -> vector<8x128xf32>
    %164 = arith.addf %105, %163 : vector<8x128xf32>
    %165 = arith.truncf %157 : vector<8x128xf32> to vector<8x128xbf16>
    %c1_96 = arith.constant 1 : index
    %c1_97 = arith.constant 1 : index
    %c0_98 = arith.constant 0 : index
    %c0_99 = arith.constant 0 : index
    %166 = vector.load %arg7[%c1_96, %c1_97, %c0_98, %c0_99] : memref<3x3x128x128xbf16, #tpu.memory_space<vmem>>, vector<1x1x128x128xbf16>
    %167 = vector.shape_cast %166 : vector<1x1x128x128xbf16> to vector<128x128xbf16>
    %cst_100 = arith.constant dense<0.000000e+00> : vector<8x128xf32>
    %168 = tpu.matmul %165, %167, %cst_100 {dimension_numbers = #tpu.dot_dimension_numbers<[1], [0], [0], [1], [0, 0, 1, 1], [], []>} : vector<8x128xbf16>, vector<128x128xbf16>, vector<8x128xf32> -> vector<8x128xf32>
    %169 = arith.addf %164, %168 : vector<8x128xf32>
    %170 = arith.truncf %159 : vector<8x128xf32> to vector<8x128xbf16>
    %c1_101 = arith.constant 1 : index
    %c2_102 = arith.constant 2 : index
    %c0_103 = arith.constant 0 : index
    %c0_104 = arith.constant 0 : index
    %171 = vector.load %arg7[%c1_101, %c2_102, %c0_103, %c0_104] : memref<3x3x128x128xbf16, #tpu.memory_space<vmem>>, vector<1x1x128x128xbf16>
    %172 = vector.shape_cast %171 : vector<1x1x128x128xbf16> to vector<128x128xbf16>
    %cst_105 = arith.constant dense<0.000000e+00> : vector<8x128xf32>
    %173 = tpu.matmul %170, %172, %cst_105 {dimension_numbers = #tpu.dot_dimension_numbers<[1], [0], [0], [1], [0, 0, 1, 1], [], []>} : vector<8x128xbf16>, vector<128x128xbf16>, vector<8x128xf32> -> vector<8x128xf32>
    %174 = arith.addf %169, %173 : vector<8x128xf32>
    %cst_106 = arith.constant 1.250000e-01 : f32
    %175 = vector.broadcast %cst_106 : f32 to vector<10x128xf32>
    %176 = arith.mulf %175, %14 : vector<10x128xf32>
    %cst_107 = arith.constant 3.750000e-01 : f32
    %177 = vector.broadcast %cst_107 : f32 to vector<10x128xf32>
    %178 = arith.mulf %177, %20 : vector<10x128xf32>
    %179 = arith.addf %176, %178 : vector<10x128xf32>
    %cst_108 = arith.constant 3.750000e-01 : f32
    %180 = vector.broadcast %cst_108 : f32 to vector<10x128xf32>
    %181 = arith.mulf %180, %26 : vector<10x128xf32>
    %182 = arith.addf %179, %181 : vector<10x128xf32>
    %cst_109 = arith.constant 1.250000e-01 : f32
    %183 = vector.broadcast %cst_109 : f32 to vector<10x128xf32>
    %184 = arith.mulf %183, %32 : vector<10x128xf32>
    %185 = arith.addf %182, %184 : vector<10x128xf32>
    %cst_110 = arith.constant 1.250000e-01 : f32
    %186 = vector.broadcast %cst_110 : f32 to vector<10x128xf32>
    %187 = arith.mulf %186, %17 : vector<10x128xf32>
    %cst_111 = arith.constant 3.750000e-01 : f32
    %188 = vector.broadcast %cst_111 : f32 to vector<10x128xf32>
    %189 = arith.mulf %188, %23 : vector<10x128xf32>
    %190 = arith.addf %187, %189 : vector<10x128xf32>
    %cst_112 = arith.constant 3.750000e-01 : f32
    %191 = vector.broadcast %cst_112 : f32 to vector<10x128xf32>
    %192 = arith.mulf %191, %29 : vector<10x128xf32>
    %193 = arith.addf %190, %192 : vector<10x128xf32>
    %cst_113 = arith.constant 1.250000e-01 : f32
    %194 = vector.broadcast %cst_113 : f32 to vector<10x128xf32>
    %195 = arith.mulf %194, %35 : vector<10x128xf32>
    %196 = arith.addf %193, %195 : vector<10x128xf32>
    %197 = vector.extract_strided_slice %185 {offsets = [0, 0], sizes = [9, 128], strides = [1, 1]} : vector<10x128xf32> to vector<9x128xf32>
    %cst_114 = arith.constant 1.250000e-01 : f32
    %198 = vector.broadcast %cst_114 : f32 to vector<9x128xf32>
    %199 = arith.mulf %198, %197 : vector<9x128xf32>
    %200 = vector.extract_strided_slice %196 {offsets = [0, 0], sizes = [9, 128], strides = [1, 1]} : vector<10x128xf32> to vector<9x128xf32>
    %cst_115 = arith.constant 3.750000e-01 : f32
    %201 = vector.broadcast %cst_115 : f32 to vector<9x128xf32>
    %202 = arith.mulf %201, %200 : vector<9x128xf32>
    %203 = arith.addf %199, %202 : vector<9x128xf32>
    %204 = vector.extract_strided_slice %185 {offsets = [1, 0], sizes = [9, 128], strides = [1, 1]} : vector<10x128xf32> to vector<9x128xf32>
    %cst_116 = arith.constant 3.750000e-01 : f32
    %205 = vector.broadcast %cst_116 : f32 to vector<9x128xf32>
    %206 = arith.mulf %205, %204 : vector<9x128xf32>
    %207 = arith.addf %203, %206 : vector<9x128xf32>
    %208 = vector.extract_strided_slice %196 {offsets = [1, 0], sizes = [9, 128], strides = [1, 1]} : vector<10x128xf32> to vector<9x128xf32>
    %cst_117 = arith.constant 1.250000e-01 : f32
    %209 = vector.broadcast %cst_117 : f32 to vector<9x128xf32>
    %210 = arith.mulf %209, %208 : vector<9x128xf32>
    %211 = arith.addf %207, %210 : vector<9x128xf32>
    %212 = vector.extract_strided_slice %196 {offsets = [0, 0], sizes = [8, 128], strides = [1, 1]} : vector<10x128xf32> to vector<8x128xf32>
    %cst_118 = arith.constant 1.250000e-01 : f32
    %213 = vector.broadcast %cst_118 : f32 to vector<8x128xf32>
    %214 = arith.mulf %213, %212 : vector<8x128xf32>
    %215 = vector.extract_strided_slice %185 {offsets = [1, 0], sizes = [8, 128], strides = [1, 1]} : vector<10x128xf32> to vector<8x128xf32>
    %cst_119 = arith.constant 3.750000e-01 : f32
    %216 = vector.broadcast %cst_119 : f32 to vector<8x128xf32>
    %217 = arith.mulf %216, %215 : vector<8x128xf32>
    %218 = arith.addf %214, %217 : vector<8x128xf32>
    %219 = vector.extract_strided_slice %196 {offsets = [1, 0], sizes = [8, 128], strides = [1, 1]} : vector<10x128xf32> to vector<8x128xf32>
    %cst_120 = arith.constant 3.750000e-01 : f32
    %220 = vector.broadcast %cst_120 : f32 to vector<8x128xf32>
    %221 = arith.mulf %220, %219 : vector<8x128xf32>
    %222 = arith.addf %218, %221 : vector<8x128xf32>
    %223 = vector.extract_strided_slice %185 {offsets = [2, 0], sizes = [8, 128], strides = [1, 1]} : vector<10x128xf32> to vector<8x128xf32>
    %cst_121 = arith.constant 1.250000e-01 : f32
    %224 = vector.broadcast %cst_121 : f32 to vector<8x128xf32>
    %225 = arith.mulf %224, %223 : vector<8x128xf32>
    %226 = arith.addf %222, %225 : vector<8x128xf32>
    %227 = vector.extract_strided_slice %211 {offsets = [0, 0], sizes = [8, 128], strides = [1, 1]} : vector<9x128xf32> to vector<8x128xf32>
    %228 = vector.extract_strided_slice %211 {offsets = [1, 0], sizes = [8, 128], strides = [1, 1]} : vector<9x128xf32> to vector<8x128xf32>
    %229 = arith.truncf %227 : vector<8x128xf32> to vector<8x128xbf16>
    %c2_122 = arith.constant 2 : index
    %c0_123 = arith.constant 0 : index
    %c0_124 = arith.constant 0 : index
    %c0_125 = arith.constant 0 : index
    %230 = vector.load %arg7[%c2_122, %c0_123, %c0_124, %c0_125] : memref<3x3x128x128xbf16, #tpu.memory_space<vmem>>, vector<1x1x128x128xbf16>
    %231 = vector.shape_cast %230 : vector<1x1x128x128xbf16> to vector<128x128xbf16>
    %cst_126 = arith.constant dense<0.000000e+00> : vector<8x128xf32>
    %232 = tpu.matmul %229, %231, %cst_126 {dimension_numbers = #tpu.dot_dimension_numbers<[1], [0], [0], [1], [0, 0, 1, 1], [], []>} : vector<8x128xbf16>, vector<128x128xbf16>, vector<8x128xf32> -> vector<8x128xf32>
    %233 = arith.addf %174, %232 : vector<8x128xf32>
    %234 = arith.truncf %226 : vector<8x128xf32> to vector<8x128xbf16>
    %c2_127 = arith.constant 2 : index
    %c1_128 = arith.constant 1 : index
    %c0_129 = arith.constant 0 : index
    %c0_130 = arith.constant 0 : index
    %235 = vector.load %arg7[%c2_127, %c1_128, %c0_129, %c0_130] : memref<3x3x128x128xbf16, #tpu.memory_space<vmem>>, vector<1x1x128x128xbf16>
    %236 = vector.shape_cast %235 : vector<1x1x128x128xbf16> to vector<128x128xbf16>
    %cst_131 = arith.constant dense<0.000000e+00> : vector<8x128xf32>
    %237 = tpu.matmul %234, %236, %cst_131 {dimension_numbers = #tpu.dot_dimension_numbers<[1], [0], [0], [1], [0, 0, 1, 1], [], []>} : vector<8x128xbf16>, vector<128x128xbf16>, vector<8x128xf32> -> vector<8x128xf32>
    %238 = arith.addf %233, %237 : vector<8x128xf32>
    %239 = arith.truncf %228 : vector<8x128xf32> to vector<8x128xbf16>
    %c2_132 = arith.constant 2 : index
    %c2_133 = arith.constant 2 : index
    %c0_134 = arith.constant 0 : index
    %c0_135 = arith.constant 0 : index
    %240 = vector.load %arg7[%c2_132, %c2_133, %c0_134, %c0_135] : memref<3x3x128x128xbf16, #tpu.memory_space<vmem>>, vector<1x1x128x128xbf16>
    %241 = vector.shape_cast %240 : vector<1x1x128x128xbf16> to vector<128x128xbf16>
    %cst_136 = arith.constant dense<0.000000e+00> : vector<8x128xf32>
    %242 = tpu.matmul %239, %241, %cst_136 {dimension_numbers = #tpu.dot_dimension_numbers<[1], [0], [0], [1], [0, 0, 1, 1], [], []>} : vector<8x128xbf16>, vector<128x128xbf16>, vector<8x128xf32> -> vector<8x128xf32>
    %243 = arith.addf %238, %242 : vector<8x128xf32>
    %c0_137 = arith.constant 0 : index
    %c0_138 = arith.constant 0 : index
    %244 = vector.load %arg8[%c0_137, %c0_138] : memref<1x128xf32, #tpu.memory_space<vmem>>, vector<1x128xf32>
    %245 = vector.broadcast %244 : vector<1x128xf32> to vector<8x128xf32>
    %246 = arith.addf %243, %245 : vector<8x128xf32>
    %cst_139 = arith.constant 0.000000e+00 : f32
    %247 = vector.broadcast %cst_139 : f32 to vector<8x128xf32>
    %248 = arith.cmpf oge, %246, %247 : vector<8x128xf32>
    %cst_140 = arith.constant 2.000000e-01 : f32
    %249 = vector.broadcast %cst_140 : f32 to vector<8x128xf32>
    %250 = arith.mulf %249, %246 : vector<8x128xf32>
    %251 = arith.select %248, %246, %250 : vector<8x128xi1>, vector<8x128xf32>
    %cst_141 = arith.constant 1.41421354 : f32
    %252 = vector.broadcast %cst_141 : f32 to vector<8x128xf32>
    %253 = arith.mulf %251, %252 : vector<8x128xf32>
    %c0_142 = arith.constant 0 : index
    %c0_143 = arith.constant 0 : index
    %c0_144 = arith.constant 0 : index
    %c0_145 = arith.constant 0 : index
    %254 = vector.load %arg5[%c0_142, %c0_143, %c0_144, %c0_145] : memref<1x2x18x128xbf16, #tpu.memory_space<vmem>>, vector<1x1x9x128xbf16>
    %255 = vector.shape_cast %254 : vector<1x1x9x128xbf16> to vector<9x128xbf16>
    %256 = arith.extf %255 : vector<9x128xbf16> to vector<9x128xf32>
    %c0_146 = arith.constant 0 : index
    %c0_147 = arith.constant 0 : index
    %c9 = arith.constant 9 : index
    %c0_148 = arith.constant 0 : index
    %257 = vector.load %arg5[%c0_146, %c0_147, %c9, %c0_148] : memref<1x2x18x128xbf16, #tpu.memory_space<vmem>>, vector<1x1x9x128xbf16>
    %258 = vector.shape_cast %257 : vector<1x1x9x128xbf16> to vector<9x128xbf16>
    %259 = arith.extf %258 : vector<9x128xbf16> to vector<9x128xf32>
    %c0_149 = arith.constant 0 : index
    %c1_150 = arith.constant 1 : index
    %c0_151 = arith.constant 0 : index
    %c0_152 = arith.constant 0 : index
    %260 = vector.load %arg5[%c0_149, %c1_150, %c0_151, %c0_152] : memref<1x2x18x128xbf16, #tpu.memory_space<vmem>>, vector<1x1x9x128xbf16>
    %261 = vector.shape_cast %260 : vector<1x1x9x128xbf16> to vector<9x128xbf16>
    %262 = arith.extf %261 : vector<9x128xbf16> to vector<9x128xf32>
    %c0_153 = arith.constant 0 : index
    %c1_154 = arith.constant 1 : index
    %c9_155 = arith.constant 9 : index
    %c0_156 = arith.constant 0 : index
    %263 = vector.load %arg5[%c0_153, %c1_154, %c9_155, %c0_156] : memref<1x2x18x128xbf16, #tpu.memory_space<vmem>>, vector<1x1x9x128xbf16>
    %264 = vector.shape_cast %263 : vector<1x1x9x128xbf16> to vector<9x128xbf16>
    %265 = arith.extf %264 : vector<9x128xbf16> to vector<9x128xf32>
    %c0_157 = arith.constant 0 : index
    %c0_158 = arith.constant 0 : index
    %c0_159 = arith.constant 0 : index
    %c0_160 = arith.constant 0 : index
    %266 = vector.load %arg6[%c0_157, %c0_158, %c0_159, %c0_160] : memref<1x2x18x128xbf16, #tpu.memory_space<vmem>>, vector<1x1x9x128xbf16>
    %267 = vector.shape_cast %266 : vector<1x1x9x128xbf16> to vector<9x128xbf16>
    %268 = arith.extf %267 : vector<9x128xbf16> to vector<9x128xf32>
    %c0_161 = arith.constant 0 : index
    %c0_162 = arith.constant 0 : index
    %c9_163 = arith.constant 9 : index
    %c0_164 = arith.constant 0 : index
    %269 = vector.load %arg6[%c0_161, %c0_162, %c9_163, %c0_164] : memref<1x2x18x128xbf16, #tpu.memory_space<vmem>>, vector<1x1x9x128xbf16>
    %270 = vector.shape_cast %269 : vector<1x1x9x128xbf16> to vector<9x128xbf16>
    %271 = arith.extf %270 : vector<9x128xbf16> to vector<9x128xf32>
    %c0_165 = arith.constant 0 : index
    %c1_166 = arith.constant 1 : index
    %c0_167 = arith.constant 0 : index
    %c0_168 = arith.constant 0 : index
    %272 = vector.load %arg6[%c0_165, %c1_166, %c0_167, %c0_168] : memref<1x2x18x128xbf16, #tpu.memory_space<vmem>>, vector<1x1x9x128xbf16>
    %273 = vector.shape_cast %272 : vector<1x1x9x128xbf16> to vector<9x128xbf16>
    %274 = arith.extf %273 : vector<9x128xbf16> to vector<9x128xf32>
    %c0_169 = arith.constant 0 : index
    %c1_170 = arith.constant 1 : index
    %c9_171 = arith.constant 9 : index
    %c0_172 = arith.constant 0 : index
    %275 = vector.load %arg6[%c0_169, %c1_170, %c9_171, %c0_172] : memref<1x2x18x128xbf16, #tpu.memory_space<vmem>>, vector<1x1x9x128xbf16>
    %276 = vector.shape_cast %275 : vector<1x1x9x128xbf16> to vector<9x128xbf16>
    %277 = arith.extf %276 : vector<9x128xbf16> to vector<9x128xf32>
    %cst_173 = arith.constant 1.250000e-01 : f32
    %278 = vector.broadcast %cst_173 : f32 to vector<9x128xf32>
    %279 = arith.mulf %278, %256 : vector<9x128xf32>
    %cst_174 = arith.constant 3.750000e-01 : f32
    %280 = vector.broadcast %cst_174 : f32 to vector<9x128xf32>
    %281 = arith.mulf %280, %262 : vector<9x128xf32>
    %282 = arith.addf %279, %281 : vector<9x128xf32>
    %cst_175 = arith.constant 3.750000e-01 : f32
    %283 = vector.broadcast %cst_175 : f32 to vector<9x128xf32>
    %284 = arith.mulf %283, %268 : vector<9x128xf32>
    %285 = arith.addf %282, %284 : vector<9x128xf32>
    %cst_176 = arith.constant 1.250000e-01 : f32
    %286 = vector.broadcast %cst_176 : f32 to vector<9x128xf32>
    %287 = arith.mulf %286, %274 : vector<9x128xf32>
    %288 = arith.addf %285, %287 : vector<9x128xf32>
    %cst_177 = arith.constant 1.250000e-01 : f32
    %289 = vector.broadcast %cst_177 : f32 to vector<9x128xf32>
    %290 = arith.mulf %289, %259 : vector<9x128xf32>
    %cst_178 = arith.constant 3.750000e-01 : f32
    %291 = vector.broadcast %cst_178 : f32 to vector<9x128xf32>
    %292 = arith.mulf %291, %265 : vector<9x128xf32>
    %293 = arith.addf %290, %292 : vector<9x128xf32>
    %cst_179 = arith.constant 3.750000e-01 : f32
    %294 = vector.broadcast %cst_179 : f32 to vector<9x128xf32>
    %295 = arith.mulf %294, %271 : vector<9x128xf32>
    %296 = arith.addf %293, %295 : vector<9x128xf32>
    %cst_180 = arith.constant 1.250000e-01 : f32
    %297 = vector.broadcast %cst_180 : f32 to vector<9x128xf32>
    %298 = arith.mulf %297, %277 : vector<9x128xf32>
    %299 = arith.addf %296, %298 : vector<9x128xf32>
    %300 = vector.extract_strided_slice %288 {offsets = [0, 0], sizes = [8, 128], strides = [1, 1]} : vector<9x128xf32> to vector<8x128xf32>
    %cst_181 = arith.constant 1.250000e-01 : f32
    %301 = vector.broadcast %cst_181 : f32 to vector<8x128xf32>
    %302 = arith.mulf %301, %300 : vector<8x128xf32>
    %303 = vector.extract_strided_slice %299 {offsets = [0, 0], sizes = [8, 128], strides = [1, 1]} : vector<9x128xf32> to vector<8x128xf32>
    %cst_182 = arith.constant 3.750000e-01 : f32
    %304 = vector.broadcast %cst_182 : f32 to vector<8x128xf32>
    %305 = arith.mulf %304, %303 : vector<8x128xf32>
    %306 = arith.addf %302, %305 : vector<8x128xf32>
    %307 = vector.extract_strided_slice %288 {offsets = [1, 0], sizes = [8, 128], strides = [1, 1]} : vector<9x128xf32> to vector<8x128xf32>
    %cst_183 = arith.constant 3.750000e-01 : f32
    %308 = vector.broadcast %cst_183 : f32 to vector<8x128xf32>
    %309 = arith.mulf %308, %307 : vector<8x128xf32>
    %310 = arith.addf %306, %309 : vector<8x128xf32>
    %311 = vector.extract_strided_slice %299 {offsets = [1, 0], sizes = [8, 128], strides = [1, 1]} : vector<9x128xf32> to vector<8x128xf32>
    %cst_184 = arith.constant 1.250000e-01 : f32
    %312 = vector.broadcast %cst_184 : f32 to vector<8x128xf32>
    %313 = arith.mulf %312, %311 : vector<8x128xf32>
    %314 = arith.addf %310, %313 : vector<8x128xf32>
    %315 = arith.truncf %314 : vector<8x128xf32> to vector<8x128xbf16>
    %c0_185 = arith.constant 0 : index
    %c0_186 = arith.constant 0 : index
    %316 = vector.load %arg9[%c0_185, %c0_186] : memref<128x128xbf16, #tpu.memory_space<vmem>>, vector<128x128xbf16>
    %cst_187 = arith.constant dense<0.000000e+00> : vector<8x128xf32>
    %317 = tpu.matmul %315, %316, %cst_187 {dimension_numbers = #tpu.dot_dimension_numbers<[1], [0], [0], [1], [0, 0, 1, 1], [], []>} : vector<8x128xbf16>, vector<128x128xbf16>, vector<8x128xf32> -> vector<8x128xf32>
    %318 = arith.addf %253, %317 : vector<8x128xf32>
    %cst_188 = arith.constant 0.707106769 : f32
    %319 = vector.broadcast %cst_188 : f32 to vector<8x128xf32>
    %320 = arith.mulf %318, %319 : vector<8x128xf32>
    %c0_189 = arith.constant 0 : index
    %c0_190 = arith.constant 0 : index
    %c0_191 = arith.constant 0 : index
    %c0_192 = arith.constant 0 : index
    %321 = vector.load %arg10[%c0_189, %c0_190, %c0_191, %c0_192] : memref<1x1x8x128xf32, #tpu.memory_space<vmem>>, vector<1x1x8x128xf32>
    %322 = vector.shape_cast %321 : vector<1x1x8x128xf32> to vector<8x128xf32>
    %323 = vector.shape_cast %320 : vector<8x128xf32> to vector<1x1x8x128xf32>
    tpu.vector_store %arg10[%c0_189, %c0_190, %c0_191, %c0_192], %323 {strides = array<i32>} : memref<1x1x8x128xf32, #tpu.memory_space<vmem>>, vector<1x1x8x128xf32>,
    return
  }
  func.func @transform_0(%arg0: i32, %arg1: i32) -> (i32, i32, i32, i32) {
    %c0_i32 = arith.constant 0 : i32
    %0 = arith.addi %arg1, %c0_i32 : i32
    %c0_i32_0 = arith.constant 0 : i32
    %c0_i32_1 = arith.constant 0 : i32
    %c0_i32_2 = arith.constant 0 : i32
    return %arg0, %0, %c0_i32_0, %c0_i32_1 : i32, i32, i32, i32
  }
  func.func @transform_1(%arg0: i32, %arg1: i32) -> (i32, i32, i32, i32) {
    %c1_i32 = arith.constant 1 : i32
    %0 = arith.addi %arg1, %c1_i32 : i32
    %c0_i32 = arith.constant 0 : i32
    %c0_i32_0 = arith.constant 0 : i32
    %c0_i32_1 = arith.constant 0 : i32
    return %arg0, %0, %c0_i32, %c0_i32_0 : i32, i32, i32, i32
  }
  func.func @transform_2(%arg0: i32, %arg1: i32) -> (i32, i32, i32, i32) {
    %c2_i32 = arith.constant 2 : i32
    %0 = arith.addi %arg1, %c2_i32 : i32
    %c0_i32 = arith.constant 0 : i32
    %c0_i32_0 = arith.constant 0 : i32
    %c0_i32_1 = arith.constant 0 : i32
    return %arg0, %0, %c0_i32, %c0_i32_0 : i32, i32, i32, i32
  }
  func.func @transform_3(%arg0: i32, %arg1: i32) -> (i32, i32, i32, i32) {
    %c0_i32 = arith.constant 0 : i32
    %0 = arith.addi %arg1, %c0_i32 : i32
    %c0_i32_0 = arith.constant 0 : i32
    %c0_i32_1 = arith.constant 0 : i32
    %c0_i32_2 = arith.constant 0 : i32
    return %arg0, %0, %c0_i32_0, %c0_i32_1 : i32, i32, i32, i32
  }
  func.func @transform_4(%arg0: i32, %arg1: i32) -> (i32, i32, i32, i32) {
    %c1_i32 = arith.constant 1 : i32
    %0 = arith.addi %arg1, %c1_i32 : i32
    %c0_i32 = arith.constant 0 : i32
    %c0_i32_0 = arith.constant 0 : i32
    %c0_i32_1 = arith.constant 0 : i32
    return %arg0, %0, %c0_i32, %c0_i32_0 : i32, i32, i32, i32
  }
  func.func @transform_5(%arg0: i32, %arg1: i32) -> (i32, i32, i32, i32) {
    %c0_i32 = arith.constant 0 : i32
    %c0_i32_0 = arith.constant 0 : i32
    %c0_i32_1 = arith.constant 0 : i32
    %c0_i32_2 = arith.constant 0 : i32
    %c0_i32_3 = arith.constant 0 : i32
    return %c0_i32, %c0_i32_0, %c0_i32_1, %c0_i32_2 : i32, i32, i32, i32
  }
  func.func @transform_6(%arg0: i32, %arg1: i32) -> (i32, i32) {
    %c0_i32 = arith.constant 0 : i32
    %c0_i32_0 = arith.constant 0 : i32
    %c0_i32_1 = arith.constant 0 : i32
    return %c0_i32, %c0_i32_0 : i32, i32
  }
  func.func @transform_7(%arg0: i32, %arg1: i32) -> (i32, i32) {
    %c0_i32 = arith.constant 0 : i32
    %c0_i32_0 = arith.constant 0 : i32
    %c0_i32_1 = arith.constant 0 : i32
    return %c0_i32, %c0_i32_0 : i32, i32
  }
  func.func @transform_8(%arg0: i32, %arg1: i32) -> (i32, i32, i32, i32) {
    %c0_i32 = arith.constant 0 : i32
    %c0_i32_0 = arith.constant 0 : i32
    %c0_i32_1 = arith.constant 0 : i32
    return %arg0, %arg1, %c0_i32, %c0_i32_0 : i32, i32, i32, i32
  }
}

</mosaic_0001>

<bundles_post_ra>
// kernel: resblock_forward.2
= control target key start
LH: loop header
LB: loop body
LE: loop exit
PB: predicated region body
PF: predicated region fallthrough
CT: control target
= control target key end

     0   :  { %s2286_s18 = smov 0   ;;  %s2288_s19 = smov 0   ;;  %s2718_s0 = inlined_call_operand.vmem [shape: bf16[2,18,18,128], index: 0, kind: input, shape index: {}, may-alias: {0,1,2}]   ;;  %s2719_s1 = inlined_call_operand.vmem [shape: bf16[2,18,18,128], index: 1, kind: input, shape index: {}, may-alias: {0,1,2}]   ;;  %s2720_s2 = inlined_call_operand.vmem [shape: bf16[2,18,18,128], index: 2, kind: input, shape index: {}, may-alias: {0,1,2}]   ;;  %s2721_s3 = inlined_call_operand.vmem [shape: bf16[3,3,128,128], index: 3, kind: input, shape index: {}]   ;;  %s2722_s4 = inlined_call_operand.vmem [shape: f32[1,128], index: 4, kind: input, shape index: {}]   ;;  %s2723_s5 = inlined_call_operand.vmem [shape: bf16[2,16,16,128], index: 5, kind: output, shape index: {}]  }
   0x1   :  { %s2290_s20 = smov 0   ;;  %s2292_s21 = smov 0  }
   0x2   :  { %s2294_s22 = smov 0  }
   0x3 LB: > { %s24_s23 = sadd.s32 1, %s2244_s20  ;;  %s27_s24 = sadd.s32 1, %s2248_s21  ;;  %s2252_s22 = sphi %s2294_s22, %s15_s22   ;;  %s2248_s21 = sphi %s2292_s21, %s2727_s21   ;;  %s2244_s20 = sphi %s2290_s20, %s2726_s20   ;;  %s2240_s19 = sphi %s2288_s19, %s2725_s19   ;;  %s2236_s18 = sphi %s2286_s18, %s2724_s18  }
   0x4   : > { %p25_p0 = scmp.ge.s32.totalorder %s24_s23, 16  ;;  %p1594_p1 = scmp.ge.s32.totalorder %s2252_s22, 1 }
   0x5   : > { %p247_p2 = scmp.lt.s32.totalorder %s2252_s22, 33 }
   0x6   : > { %s2729_s23 = smov (%p25_p0, %s24_s23), 0  ;;  %s2731_s24 = smov (!%p25_p0, %s27_s24), %s2248_s21 }
   0x7   : > { %p248_p3 = pnand %p1594_p1, %p247_p2  ;;  %p29_p4 = scmp.ge.s32.totalorder %s2731_s24, 2 }
   0x8   : > { %p303_p5 = scmp.lt.s32.totalorder (!%p248_p3), %s2240_s19, 1  ;;  %p305_p6 = scmp.lt.s32.totalorder (!%p248_p3), %s2236_s18, 17 }
   0x9   : > { %s2733_s24 = smov (%p29_p4, %s2731_s24), 0  ;;  %251 = sbr.rel (%p248_p3) target bundleno = 384 (0x180), region = 40 }
   0xa   : > { %s312_s28 = sadd.s32 (!%p248_p3), 1, %s2236_s18  ;;  %p336_p9 = scmp.lt.s32.totalorder (!%p248_p3), %s2236_s18, 15 }
   0xb   : > { %p315_p7 = scmp.lt.s32.totalorder (!%p248_p3), %s312_s28, 17 }
   0xe   : > { %v2131_v0 = vld [vmem:[%s2721_s3 + $0x78] sm:$0xff]   ;;  %v2254_v1 = vmov 0.0   ;;  %v2133_v3 = vld [vmem:[%s2721_s3 + $0x70] sm:$0xff]   ;;  %vm2255_vm0 = vmmov 0   ;;  %s2735_s19 = smov (!%p303_p5, %s2240_s19), 1  ;;  %v2135_v5 = vld [vmem:[%s2721_s3 + $0x68] sm:$0xff]  }
   0xf   : > { %1905 = vmatprep.subr.bf16.mxu0 %v2254_v1  ;;  %1925 = vmatprep.subr.bf16.mxu1 %v2254_v1  ;;  %v2132_v2 = vld [vmem:[%s2721_s3 + $0x38] sm:$0xff]   ;;  %v2134_v4 = vld [vmem:[%s2721_s3 + $0x30] sm:$0xff]   ;;  %s306_s8 = scalar_select %p305_p6, %s2236_s18, 17  ;;  %v2136_v6 = vld [vmem:[%s2721_s3 + $0x28] sm:$0xff]   ;;  %vm388_vm1 = vsmask.f32 7424 }
  0x10   : > { %1906 = vmatpush3.bf16.msra.mxu0 %v2131_v0  ;;  %1921 = vmatprep.mubr.msk.bf16.mxu0 %vm2255_vm0, %v2254_v1  ;;  %s2350_s11 = smul.u32 54, %s2735_s19  ;;  %v2137_v7 = vld [vmem:[%s2721_s3 + $0x60] sm:$0xff]   ;;  %v2139_v9 = vld [vmem:[%s2721_s3 + $0x58] sm:$0xff]   ;;  %v2141_v13 = vld [vmem:[%s2721_s3 + $0x50] sm:$0xff]   ;;  %s2737_s28 = smov (!%p315_p7, %s312_s28), 17  ;;  %vm602_vm2 = vcmask 1046528  }
  0x11   : > { %1926 = vmatpush3.bf16.msra.mxu1 %v2132_v2  ;;  %1907 = vmatprep.subr.bf16.mxu0 %v2254_v1  ;;  %s2085_s14 = smul.u32 3, %s306_s8  ;;  %v2138_v8 = vld [vmem:[%s2721_s3 + $0x20] sm:$0xff]   ;;  %v2140_v10 = vld [vmem:[%s2721_s3 + $0x18] sm:$0xff]   ;;  %v2142_v16 = vld [vmem:[%s2721_s3 + $0x10] sm:$0xff]  }
  0x12   : > { %1927 = vmatprep.subr.bf16.mxu1 %v2254_v1  ;;  %1941 = vmatprep.mubr.msk.bf16.mxu1 %vm2255_vm0, %v2254_v1  ;;  %v2143_v18 = vld [vmem:[%s2721_s3 + $0x48] sm:$0xff]   ;;  %s2087_s27 = smul.u32 3, %s2737_s28  ;;  %v2145_v23 = vld [vmem:[%s2721_s3 + $0x40] sm:$0xff]   ;;  %v2149_v28 = vld [vmem:[%s2721_s3 + $0xb8] sm:$0xff]  }
  0x13   : > { %s309_s15 = sadd.s32 %s2350_s11, %s2085_s14  ;;  %v2144_v22 = vld [vmem:[%s2721_s3 + $0x8] sm:$0xff]   ;;  %v2146_v24 = vld [vmem:[%s2721_s3] sm:$0xff]   ;;  %v2150_v29 = vld [vmem:[%s2721_s3 + $0xf8] sm:$0xff]  }
  0x14   : > { %1908 = vmatpush3.bf16.msra.mxu0 %v2133_v3  ;;  %s1595_s25 = sshll.u32 %s309_s15, 2  ;;  %s319_s9 = sadd.s32 %s2087_s27, %s2350_s11  ;;  %v2151_v30 = vld [vmem:[%s2721_s3 + $0xb0] sm:$0xff]   ;;  %v2153_v32 = vld [vmem:[%s2721_s3 + $0xa8] sm:$0xff]   ;;  %v2155_v34 = vld [vmem:[%s2721_s3 + $0xa0] sm:$0xff]  }
  0x15   : > { %1928 = vmatpush3.bf16.msra.mxu1 %v2134_v4  ;;  %1909 = vmatprep.subr.bf16.mxu0 %v2254_v1  ;;  %s2370_s6 = scalar_lea.vmem %s2718_s0, %s1595_s25  ;;  %s1596_s14 = sshll.u32 %s319_s9, 2  ;;  %v2152_v31 = vld [vmem:[%s2721_s3 + $0xf0] sm:$0xff]   ;;  %v2154_v33 = vld [vmem:[%s2721_s3 + $0xe8] sm:$0xff]   ;;  %v2156_v35 = vld [vmem:[%s2721_s3 + $0xe0] sm:$0xff]  }
  0x16   : > { %1929 = vmatprep.subr.bf16.mxu1 %v2254_v1  ;;  %v344_v11 = vld [vmem:[%s2370_s6] sm:$0xf]  ;;  %v2382_v12 = vld [vmem:[%s2370_s6 + $0x4] sm:$0xf]  ;;  %s2429_s26 = scalar_lea.vmem %s2719_s1, %s1596_s14  ;;  %v2157_v36 = vld [vmem:[%s2721_s3 + $0x98] sm:$0xff]   ;;  %s323_s25 = sadd.s32 2, %s2236_s18 }
  0x17   : > { %v1617_v14 = vcombine.low %v344_v11, %v2382_v12  ;;  %v2389_v15 = vld [vmem:[%s2370_s6 + $0x8] ss:$0 sps:$4 sm:$0x11]   ;;  %v2158_v37 = vld [vmem:[%s2721_s3 + $0xd8] sm:$0xff]   ;;  %v2159_v38 = vld [vmem:[%s2721_s3 + $0x90] sm:$0xff]   ;;  %p326_p8 = scmp.lt.s32.totalorder %s323_s25, 17 }
  0x18   : > { %1910 = vmatpush3.bf16.msra.mxu0 %v2135_v5  ;;  %v397_v21 = vshll.u32 %v2389_v15, 16  ;;  %v2160_v39 = vld [vmem:[%s2721_s3 + $0xd0] sm:$0xff]   ;;  %v581_v40 = vld [vmem:[%s2370_s6] sm:$0xe]  ;;  %v2161_v41 = vld [vmem:[%s2721_s3 + $0x88] sm:$0xff]   ;;  %v604_v44 = vrot.slane %v2389_v15, 1 }
  0x19   : > { %1930 = vmatpush3.bf16.msra.mxu1 %v2136_v6  ;;  %1911 = vmatprep.subr.bf16.mxu0 %v2254_v1  ;;  %v392_v17 = vshll.u32 %v1617_v14, 16  ;;  %v390_v19 = vshrl.u32 %v1617_v14, 16  ;;  %v1651_v42 = vcombine.low %v581_v40, %v2382_v12  ;;  %v2162_v43 = vld [vmem:[%s2721_s3 + $0xc8] sm:$0xff]   ;;  %s2739_s25 = smov (!%p326_p8, %s323_s25), 17  ;;  %v2163_v45 = vld [vmem:[%s2721_s3 + $0x80] sm:$0xff]   ;;  %v2166_v48 = vld [vmem:[%s2721_s3 + $0x138] sm:$0xff]  }
  0x1a   : > { %1931 = vmatprep.subr.bf16.mxu1 %v2254_v1  ;;  %v399_v26 = vrot.slane %v397_v21, 1  ;;  %v2164_v47 = vld [vmem:[%s2721_s3 + $0xc0] sm:$0xff]   ;;  %s2088_s15 = smul.u32 3, %s2739_s25  ;;  %v2168_v51 = vld [vmem:[%s2721_s3 + $0x178] sm:$0xff]   ;;  %v2169_v52 = vld [vmem:[%s2721_s3 + $0x130] sm:$0xff]   ;;  %s2741_s18 = smov (!%p336_p9, %s2236_s18), 15 }
  0x1b   : > { %v394_v20 = vrot.slane %v392_v17, 1  ;;  %v603_v46 = vrot.slane %v1651_v42, 1  ;;  %v2167_v50 = vld [vmem:[%s2429_s26] sm:$0xff]   ;;  %v2170_v53 = vld [vmem:[%s2721_s3 + $0x170] sm:$0xff]   ;;  %v2171_v54 = vld [vmem:[%s2721_s3 + $0x128] sm:$0xff]   ;;  %s1598_s17 = sshll.u32 %s2741_s18, 1 }
  0x1c   : > { %1912 = vmatpush3.bf16.msra.mxu0 %v2137_v7  ;;  %s330_s30 = sadd.s32 %s2088_s15, %s2350_s11  ;;  %v2172_v55 = vld [vmem:[%s2721_s3 + $0x168] sm:$0xff]   ;;  %v2173_v56 = vld [vmem:[%s2721_s3 + $0x120] sm:$0xff]   ;;  %v2175_v60 = vld [vmem:[%s2721_s3 + $0x118] sm:$0xff]   ;;  %s1599_s27 = sshll.u32 %s2735_s19, 5 }
  0x1d   : > { %1932 = vmatpush3.bf16.msra.mxu1 %v2138_v8  ;;  %1913 = vmatprep.subr.bf16.mxu0 %v2254_v1  ;;  %v395_v25 = vor.u32 %v394_v20, %v390_v19  ;;  %v605_v49 = vsel %vm602_vm2, %v603_v46, %v604_v44  ;;  %s1597_s8 = sshll.u32 %s330_s30, 2  ;;  %v2174_v57 = vld [vmem:[%s2721_s3 + $0x160] sm:$0xff]   ;;  %v2176_v63 = vld [vmem:[%s2721_s3 + $0x158] sm:$0xff]   ;;  %v2177_v5 = vld [vmem:[%s2721_s3 + $0x110] sm:$0xff]   ;;  %s340_s29 = sadd.s32 %s1599_s27, %s1598_s17 }
  0x1e   : > { %1933 = vmatprep.subr.bf16.mxu1 %v2254_v1  ;;  %s2518_s6 = scalar_lea.vmem %s2720_s2, %s1597_s8  ;;  %v814_v58 = vld [vmem:[%s2429_s26] sm:$0xf]  ;;  %v815_v59 = vld [vmem:[%s2429_s26 + $0x4] sm:$0xf]  ;;  %v2178_v8 = vld [vmem:[%s2721_s3 + $0x150] sm:$0xff]   ;;  %s1600_s30 = sshll.u32 %s340_s29, 2 }
  0x1f   : > { %v400_v27 = vsel %vm388_vm1, %v395_v25, %v399_v26  ;;  %v2542_v61 = vld [vmem:[%s2518_s6 + $0x8] ss:$0 sps:$4 sm:$0x11]   ;;  %v1701_v62 = vcombine.low %v814_v58, %v815_v59  ;;  %v2550_v0 = vld [vmem:[%s2518_s6 + $0x4] sm:$0xf]  ;;  %v2185_v25 = vld [vmem:[%s2721_s3 + $0x1b8] sm:$0xff]   ;;  %s342_s7 = scalar_lea.vmem %s2723_s5, %s1600_s30 }
  0x20   : > { %1914 = vmatpush3.bf16.msra.mxu0 %v2139_v9  ;;  %v1310_v2 = vld [vmem:[%s2518_s6] sm:$0xe]  ;;  %v1332_v4 = vrot.slane %v2542_v61, 1  ;;  %v2184_v6 = vld [vmem:[%s2429_s26 + $0x8] ss:$0 sps:$4 sm:$0x11]  }
  0x21   : > { %1934 = vmatpush3.bf16.msra.mxu1 %v2140_v10  ;;  %1915 = vmatprep.subr.bf16.mxu0 %v2254_v1  ;;  %v1803_v3 = vcombine.low %v1310_v2, %v2550_v0  ;;  %v845_v7 = vshll.u32 %v1701_v62, 16  ;;  %v946_v10 = vld [vmem:[%s2429_s26] sm:$0xe]  ;;  %v2179_v12 = vld [vmem:[%s2721_s3 + $0x108] sm:$0xff]   ;;  %v850_v15 = vshll.u32 %v2184_v6, 16 }
  0x22   : > { %1935 = vmatprep.subr.bf16.mxu1 %v2254_v1  ;;  %v1727_v17 = vcombine.low %v946_v10, %v815_v59  ;;  %v2182_v21 = vld [vmem:[%s2721_s3 + $0x140] sm:$0xff]   ;;  %v2199_v42 = vld [vmem:[%s2721_s3 + $0x1c8] sm:$0xff]  }
  0x23   : > { %v1331_v9 = vrot.slane %v1803_v3, 1  ;;  %v852_v20 = vrot.slane %v850_v15, 1  ;;  %v2200_v46 = vld [vmem:[%s2721_s3 + $0x180] sm:$0xff]   ;;  %v2211_v58 = vld [vmem:[%s2721_s3 + $0x208] sm:$0xff]  }
  0x24   : > { %1916 = vmatpush3.bf16.msra.mxu0 %v2141_v13  ;;  %v843_v13 = vshrl.u32 %v1701_v62, 16  ;;  %v2212_v59 = vld [vmem:[%s2721_s3 + $0x200] sm:$0xff]  }
  0x25   : > { %1936 = vmatpush3.bf16.msra.mxu1 %v2142_v16  ;;  %1917 = vmatprep.subr.bf16.mxu0 %v2254_v1  ;;  %v2566_v11 = vsel %vm602_vm2, %v1331_v9, %v1332_v4  ;;  %v2180_v16 = vld [vmem:[%s2721_s3 + $0x148] sm:$0xff]  }
  0x26   : > { %1937 = vmatprep.subr.bf16.mxu1 %v2254_v1 }
  0x28   : > { %1918 = vmatpush3.bf16.msra.mxu0 %v2143_v18  ;;  %v2181_v18 = vld [vmem:[%s2721_s3 + $0x100] sm:$0xff]  }
  0x29   : > { %1938 = vmatpush3.bf16.msra.mxu1 %v2144_v22  ;;  %1919 = vmatprep.subr.bf16.mxu0 %v2254_v1  ;;  %v967_v22 = vrot.slane %v1727_v17, 1 }
  0x2a   : > { %1939 = vmatprep.subr.bf16.mxu1 %v2254_v1 }
  0x2c   : > { %1920 = vmatpush3.bf16.msra.mxu0 %v2145_v23  ;;  %v968_v23 = vrot.slane %v2184_v6, 1 }
  0x2d   : > { %1940 = vmatpush3.bf16.msra.mxu1 %v2146_v24  ;;  %1945 = vmatprep.subr.bf16.mxu0 %v2254_v1 }
  0x2e   : > { %1965 = vmatprep.subr.bf16.mxu1 %v2254_v1  ;;  %v969_v26 = vsel %vm602_vm2, %v967_v22, %v968_v23 }
  0x2f   : > { %1922 = vmatmul.mubr.bf16.vlgmr.msra.gmra.mxu0 %v400_v27  ;;  %v2187_v27 = vld [vmem:[%s2721_s3 + $0x1f8] sm:$0xff]  }
  0x30   : > { %1942 = vmatmul.mubr.bf16.vlgmr.msra.gmra.mxu1 %v1617_v14  ;;  %1946 = vmatpush3.bf16.msra.mxu0 %v2149_v28  ;;  %v847_v14 = vrot.slane %v845_v7, 1  ;;  %v2188_v28 = vld [vmem:[%s2721_s3 + $0x1b0] sm:$0xff]  }
  0x31   : > { %1966 = vmatpush3.bf16.msra.mxu1 %v2150_v29  ;;  %1947 = vmatprep.subr.bf16.mxu0 %v2254_v1  ;;  %v2189_v29 = vld [vmem:[%s2721_s3 + $0x1f0] sm:$0xff]  }
  0x32   : > { %1967 = vmatprep.subr.bf16.mxu1 %v2254_v1  ;;  %1961 = vmatprep.mubr.msk.bf16.mxu0 %vm2255_vm0, %v2254_v1  ;;  %v848_v19 = vor.u32 %v847_v14, %v843_v13 }
  0x33   : > { %1981 = vmatprep.mubr.msk.bf16.mxu1 %vm2255_vm0, %v2254_v1 }
  0x34   : > { %1948 = vmatpush3.bf16.msra.mxu0 %v2151_v30  ;;  %v853_v24 = vsel %vm388_vm1, %v848_v19, %v852_v20  ;;  %v2190_v30 = vld [vmem:[%s2721_s3 + $0x1a8] sm:$0xff]  }
  0x35   : > { %1968 = vmatpush3.bf16.msra.mxu1 %v2152_v31  ;;  %1949 = vmatprep.subr.bf16.mxu0 %v2254_v1  ;;  %v2191_v31 = vld [vmem:[%s2721_s3 + $0x1e8] sm:$0xff]  }
  0x36   : > { %1969 = vmatprep.subr.bf16.mxu1 %v2254_v1 }
  0x38   : > { %1950 = vmatpush3.bf16.msra.mxu0 %v2153_v32  ;;  %v2192_v32 = vld [vmem:[%s2721_s3 + $0x1a0] sm:$0xff]  }
  0x39   : > { %1970 = vmatpush3.bf16.msra.mxu1 %v2154_v33  ;;  %1951 = vmatprep.subr.bf16.mxu0 %v2254_v1  ;;  %v2193_v33 = vld [vmem:[%s2721_s3 + $0x1e0] sm:$0xff]  }
  0x3a   : > { %1971 = vmatprep.subr.bf16.mxu1 %v2254_v1 }
  0x3c   : > { %1952 = vmatpush3.bf16.msra.mxu0 %v2155_v34  ;;  %v1178_v34 = vld [vmem:[%s2518_s6] sm:$0xf] }
  0x3d   : > { %1972 = vmatpush3.bf16.msra.mxu1 %v2156_v35  ;;  %1953 = vmatprep.subr.bf16.mxu0 %v2254_v1  ;;  %v2194_v35 = vld [vmem:[%s2721_s3 + $0x198] sm:$0xff]  }
  0x3e   : > { %1973 = vmatprep.subr.bf16.mxu1 %v2254_v1 }
  0x40   : > { %1954 = vmatpush3.bf16.msra.mxu0 %v2157_v36  ;;  %v2195_v36 = vld [vmem:[%s2721_s3 + $0x1d8] sm:$0xff]  }
  0x41   : > { %1974 = vmatpush3.bf16.msra.mxu1 %v2158_v37  ;;  %1955 = vmatprep.subr.bf16.mxu0 %v2254_v1  ;;  %v1777_v37 = vcombine.low %v1178_v34, %v2550_v0 }
  0x42   : > { %1975 = vmatprep.subr.bf16.mxu1 %v2254_v1 }
  0x43   : > { %v1209_v40 = vshll.u32 %v1777_v37, 16 }
  0x44   : > { %1956 = vmatpush3.bf16.msra.mxu0 %v2159_v38  ;;  %v2196_v38 = vld [vmem:[%s2721_s3 + $0x190] sm:$0xff]  }
  0x45   : > { %1976 = vmatpush3.bf16.msra.mxu1 %v2160_v39  ;;  %1957 = vmatprep.subr.bf16.mxu0 %v2254_v1  ;;  %v2197_v39 = vld [vmem:[%s2721_s3 + $0x1d0] sm:$0xff]   ;;  %v1211_v44 = vrot.slane %v1209_v40, 1 }
  0x46   : > { %1977 = vmatprep.subr.bf16.mxu1 %v2254_v1 }
  0x48   : > { %1958 = vmatpush3.bf16.msra.mxu0 %v2161_v41  ;;  %v2198_v41 = vld [vmem:[%s2721_s3 + $0x188] sm:$0xff]  }
  0x49   : > { %1978 = vmatpush3.bf16.msra.mxu1 %v2162_v43  ;;  %1959 = vmatprep.subr.bf16.mxu0 %v2254_v1  ;;  %v1207_v43 = vshrl.u32 %v1777_v37, 16 }
  0x4a   : > { %1979 = vmatprep.subr.bf16.mxu1 %v2254_v1 }
  0x4c   : > { %1960 = vmatpush3.bf16.msra.mxu0 %v2163_v45  ;;  %v1214_v45 = vshll.u32 %v2542_v61, 16 }
  0x4d   : > { %1980 = vmatpush3.bf16.msra.mxu1 %v2164_v47  ;;  %1985 = vmatprep.subr.bf16.mxu0 %v2254_v1  ;;  %v2201_v47 = vld [vmem:[%s2721_s3 + $0x1c0] sm:$0xff]  }
  0x4e   : > { %2005 = vmatprep.subr.bf16.mxu1 %v2254_v1 }
  0x4f   : > { %1962 = vmatmul.mubr.bf16.vlgmr.msra.gmra.mxu0 %v605_v49  ;;  %v1216_v49 = vrot.slane %v1214_v45, 1 }
  0x50   : > { %1986 = vmatpush3.bf16.msra.mxu0 %v2166_v48  ;;  %1982 = vmatmul.mubr.bf16.vlgmr.msra.gmra.mxu1 %v2167_v50  ;;  %v1212_v48 = vor.u32 %v1211_v44, %v1207_v43  ;;  %v2202_v50 = vld [vmem:[%s2518_s6] sm:$0xff]  }
  0x51   : > { %2006 = vmatpush3.bf16.msra.mxu1 %v2168_v51  ;;  %1987 = vmatprep.subr.bf16.mxu0 %v2254_v1  ;;  %v2203_v51 = vld [vmem:[%s2721_s3 + $0x238] sm:$0xff]  }
  0x52   : > { %2007 = vmatprep.subr.bf16.mxu1 %v2254_v1  ;;  %2001 = vmatprep.mubr.msk.bf16.mxu0 %vm2255_vm0, %v2254_v1 }
  0x53   : > { %2021 = vmatprep.mubr.msk.bf16.mxu1 %vm2255_vm0, %v2254_v1 }
  0x54   : > { %1988 = vmatpush3.bf16.msra.mxu0 %v2169_v52  ;;  %v1217_v52 = vsel %vm388_vm1, %v1212_v48, %v1216_v49 }
  0x55   : > { %2008 = vmatpush3.bf16.msra.mxu1 %v2170_v53  ;;  %1989 = vmatprep.subr.bf16.mxu0 %v2254_v1  ;;  %v2206_v53 = vld [vmem:[%s2721_s3 + $0x230] sm:$0xff]  }
  0x56   : > { %2009 = vmatprep.subr.bf16.mxu1 %v2254_v1 }
  0x58   : > { %1990 = vmatpush3.bf16.msra.mxu0 %v2171_v54  ;;  %v2207_v54 = vld [vmem:[%s2721_s3 + $0x228] sm:$0xff]  }
  0x59   : > { %2010 = vmatpush3.bf16.msra.mxu1 %v2172_v55  ;;  %1991 = vmatprep.subr.bf16.mxu0 %v2254_v1  ;;  %v2208_v55 = vld [vmem:[%s2721_s3 + $0x220] sm:$0xff]  }
  0x5a   : > { %2011 = vmatprep.subr.bf16.mxu1 %v2254_v1 }
  0x5c   : > { %1992 = vmatpush3.bf16.msra.mxu0 %v2173_v56  ;;  %v2209_v56 = vld [vmem:[%s2721_s3 + $0x218] sm:$0xff]  }
  0x5d   : > { %2012 = vmatpush3.bf16.msra.mxu1 %v2174_v57  ;;  %1993 = vmatprep.subr.bf16.mxu0 %v2254_v1  ;;  %v2210_v57 = vld [vmem:[%s2721_s3 + $0x210] sm:$0xff]  }
  0x5e   : > { %2013 = vmatprep.subr.bf16.mxu1 %v2254_v1 }
  0x60   : > { %1994 = vmatpush3.bf16.msra.mxu0 %v2175_v60 }
  0x61   : > { %2014 = vmatpush3.bf16.msra.mxu1 %v2176_v63  ;;  %1995 = vmatprep.subr.bf16.mxu0 %v2254_v1 }
  0x62   : > { %2015 = vmatprep.subr.bf16.mxu1 %v2254_v1 }
  0x64   : > { %1996 = vmatpush3.bf16.msra.mxu0 %v2177_v5 }
  0x65   : > { %2016 = vmatpush3.bf16.msra.mxu1 %v2178_v8  ;;  %1997 = vmatprep.subr.bf16.mxu0 %v2254_v1 }
  0x66   : > { %2017 = vmatprep.subr.bf16.mxu1 %v2254_v1 }
  0x68   : > { %1998 = vmatpush3.bf16.msra.mxu0 %v2179_v12 }
  0x69   : > { %2018 = vmatpush3.bf16.msra.mxu1 %v2180_v16  ;;  %1999 = vmatprep.subr.bf16.mxu0 %v2254_v1 }
  0x6a   : > { %2019 = vmatprep.subr.bf16.mxu1 %v2254_v1 }
  0x6c   : > { %2000 = vmatpush3.bf16.msra.mxu0 %v2181_v18 }
  0x6d   : > { %2020 = vmatpush3.bf16.msra.mxu1 %v2182_v21  ;;  %2025 = vmatprep.subr.bf16.mxu0 %v2254_v1 }
  0x6e   : > { %2045 = vmatprep.subr.bf16.mxu1 %v2254_v1 }
  0x6f   : > { %2002 = vmatmul.mubr.bf16.vlgmr.msra.gmra.mxu0 %v853_v24 }
  0x70   : > { %2026 = vmatpush3.bf16.msra.mxu0 %v2185_v25  ;;  %2022 = vmatmul.mubr.bf16.vlgmr.msra.gmra.mxu1 %v969_v26 }
  0x71   : > { %2046 = vmatpush3.bf16.msra.mxu1 %v2187_v27  ;;  %2027 = vmatprep.subr.bf16.mxu0 %v2254_v1 }
  0x72   : > { %2047 = vmatprep.subr.bf16.mxu1 %v2254_v1  ;;  %2041 = vmatprep.mubr.msk.bf16.mxu0 %vm2255_vm0, %v2254_v1 }
  0x73   : > { %2061 = vmatprep.mubr.msk.bf16.mxu1 %vm2255_vm0, %v2254_v1 }
  0x74   : > { %2028 = vmatpush3.bf16.msra.mxu0 %v2188_v28 }
  0x75   : > { %2048 = vmatpush3.bf16.msra.mxu1 %v2189_v29  ;;  %2029 = vmatprep.subr.bf16.mxu0 %v2254_v1 }
  0x76   : > { %2049 = vmatprep.subr.bf16.mxu1 %v2254_v1 }
  0x78   : > { %2030 = vmatpush3.bf16.msra.mxu0 %v2190_v30 }
  0x79   : > { %2050 = vmatpush3.bf16.msra.mxu1 %v2191_v31  ;;  %2031 = vmatprep.subr.bf16.mxu0 %v2254_v1 }
  0x7a   : > { %2051 = vmatprep.subr.bf16.mxu1 %v2254_v1 }
  0x7c   : > { %2032 = vmatpush3.bf16.msra.mxu0 %v2192_v32 }
  0x7d   : > { %2052 = vmatpush3.bf16.msra.mxu1 %v2193_v33  ;;  %2033 = vmatprep.subr.bf16.mxu0 %v2254_v1 }
  0x7e   : > { %2053 = vmatprep.subr.bf16.mxu1 %v2254_v1 }
  0x80   : > { %2034 = vmatpush3.bf16.msra.mxu0 %v2194_v35 }
  0x81   : > { %2054 = vmatpush3.bf16.msra.mxu1 %v2195_v36  ;;  %2035 = vmatprep.subr.bf16.mxu0 %v2254_v1 }
  0x82   : > { %2055 = vmatprep.subr.bf16.mxu1 %v2254_v1 }
  0x84   : > { %2036 = vmatpush3.bf16.msra.mxu0 %v2196_v38 }
  0x85   : > { %2056 = vmatpush3.bf16.msra.mxu1 %v2197_v39  ;;  %2037 = vmatprep.subr.bf16.mxu0 %v2254_v1 }
  0x86   : > { %2057 = vmatprep.subr.bf16.mxu1 %v2254_v1 }
  0x88   : > { %2038 = vmatpush3.bf16.msra.mxu0 %v2198_v41 }
  0x89   : > { %2058 = vmatpush3.bf16.msra.mxu1 %v2199_v42  ;;  %2039 = vmatprep.subr.bf16.mxu0 %v2254_v1  ;;  %v1812_v42 = vld [vmem:[%s2722_s4] ss:$0 sm:$0xff] }
  0x8a   : > { %2059 = vmatprep.subr.bf16.mxu1 %v2254_v1 }
  0x8c   : > { %2040 = vmatpush3.bf16.msra.mxu0 %v2200_v46 }
  0x8d   : > { %2060 = vmatpush3.bf16.msra.mxu1 %v2201_v47  ;;  %2065 = vmatprep.subr.bf16.mxu0 %v2254_v1 }
  0x8f   : > { %2042 = vmatmul.mubr.bf16.vlgmr.msra.gmra.mxu0 %v2202_v50 }
  0x90   : > { %2066 = vmatpush3.bf16.msra.mxu0 %v2203_v51  ;;  %2062 = vmatmul.mubr.bf16.vlgmr.msra.gmra.mxu1 %v1217_v52 }
  0x91   : > { %2067 = vmatprep.subr.bf16.mxu0 %v2254_v1  ;;  %2081 = vmatprep.mubr.msk.bf16.mxu0 %vm2255_vm0, %v2254_v1 }
  0x94   : > { %2068 = vmatpush3.bf16.msra.mxu0 %v2206_v53 }
  0x95   : > { %2069 = vmatprep.subr.bf16.mxu0 %v2254_v1 }
  0x98   : > { %2070 = vmatpush3.bf16.msra.mxu0 %v2207_v54 }
  0x99   : > { %2071 = vmatprep.subr.bf16.mxu0 %v2254_v1 }
  0x9c   : > { %2072 = vmatpush3.bf16.msra.mxu0 %v2208_v55 }
  0x9d   : > { %2073 = vmatprep.subr.bf16.mxu0 %v2254_v1 }
  0xa0   : > { %2074 = vmatpush3.bf16.msra.mxu0 %v2209_v56 }
  0xa1   : > { %2075 = vmatprep.subr.bf16.mxu0 %v2254_v1 }
  0xa4   : > { %2076 = vmatpush3.bf16.msra.mxu0 %v2210_v57 }
  0xa5   : > { %2077 = vmatprep.subr.bf16.mxu0 %v2254_v1 }
  0xa8   : > { %2078 = vmatpush3.bf16.msra.mxu0 %v2211_v58 }
  0xa9   : > { %2079 = vmatprep.subr.bf16.mxu0 %v2254_v1 }
  0xac   : > { %2080 = vmatpush3.bf16.msra.mxu0 %v2212_v59 }
  0xaf   : > { %2082 = vmatmul.mubr.bf16.vlgmr.msra.gmra.mxu0 %v2566_v11 }
  0xef   : > { %v484_v60 = vpop.f32.mrf.mxu0 }
  0xf0   : > { %v574_v61 = vpop.f32.mrf.mxu1 }
  0xf1   : > { %v575_v62 = vadd.f32 %v574_v61, %v484_v60  ;;  %v1923_v63 = vpop.f32.mrf.mxu0 }
  0xf2   : > { %v1943_v0 = vpop.f32.mrf.mxu1 }
  0xf3   : > { %v487_v2 = vpop.f32.mrf.mxu0 }
  0xf4   : > { %v577_v3 = vpop.f32.mrf.mxu1 }
  0xf5   : > { %v578_v4 = vadd.f32 %v577_v3, %v487_v2  ;;  %v1924_v5 = vpop.f32.mrf.mxu0 }
  0xf6   : > { %v1944_v6 = vpop.f32.mrf.mxu1 }
 0x10f   : > { %v689_v7 = vpop.f32.mrf.mxu0 }
 0x110   : > { %v696_v8 = vadd.f32 %v689_v7, %v575_v62  ;;  %v805_v9 = vpop.f32.mrf.mxu1 }
 0x111   : > { %v1963_v10 = vpop.f32.mrf.mxu0 }
 0x112   : > { %v812_v12 = vadd.f32 %v805_v9, %v696_v8  ;;  %v1983_v13 = vpop.f32.mrf.mxu1 }
 0x113   : > { %v692_v1 = vpop.f32.mrf.mxu0 }
 0x114   : > { %v697_v14 = vadd.f32 %v692_v1, %v578_v4  ;;  %v808_v15 = vpop.f32.mrf.mxu1 }
 0x115   : > { %v1964_v11 = vpop.f32.mrf.mxu0 }
 0x116   : > { %v813_v16 = vadd.f32 %v808_v15, %v697_v14  ;;  %v1984_v17 = vpop.f32.mrf.mxu1 }
 0x12f   : > { %v937_v18 = vpop.f32.mrf.mxu0 }
 0x130   : > { %v1053_v19 = vpop.f32.mrf.mxu1  ;;  %v944_v34 = vadd.f32 %v937_v18, %v812_v12 }
 0x131   : > { %v2003_v20 = vpop.f32.mrf.mxu0 }
 0x132   : > { %v2023_v21 = vpop.f32.mrf.mxu1  ;;  %v1060_v35 = vadd.f32 %v1053_v19, %v944_v34 }
 0x133   : > { %v940_v22 = vpop.f32.mrf.mxu0 }
 0x134   : > { %v1056_v23 = vpop.f32.mrf.mxu1  ;;  %v945_v36 = vadd.f32 %v940_v22, %v813_v16 }
 0x135   : > { %v2004_v24 = vpop.f32.mrf.mxu0 }
 0x136   : > { %v2024_v25 = vpop.f32.mrf.mxu1  ;;  %v1061_v38 = vadd.f32 %v1056_v23, %v945_v36 }
 0x14f   : > { %v1169_v26 = vpop.f32.mrf.mxu0 }
 0x150   : > { %v1301_v27 = vpop.f32.mrf.mxu1  ;;  %v1176_v37 = vadd.f32 %v1169_v26, %v1060_v35 }
 0x151   : > { %v2043_v28 = vpop.f32.mrf.mxu0 }
 0x152   : > { %v2063_v29 = vpop.f32.mrf.mxu1  ;;  %v1308_v39 = vadd.f32 %v1301_v27, %v1176_v37 }
 0x153   : > { %v1172_v30 = vpop.f32.mrf.mxu0 }
 0x154   : > { %v1304_v31 = vpop.f32.mrf.mxu1  ;;  %v1177_v40 = vadd.f32 %v1172_v30, %v1061_v38 }
 0x155   : > { %v2044_v32 = vpop.f32.mrf.mxu0 }
 0x156   : > { %v2064_v33 = vpop.f32.mrf.mxu1  ;;  %v1309_v45 = vadd.f32 %v1304_v31, %v1177_v40 }
 0x16f   : > { %v1417_v41 = vpop.f32.mrf.mxu0 }
 0x170   : > { %v1424_v43 = vadd.f32 %v1417_v41, %v1308_v39 }
 0x171   : > { %v2083_v44 = vpop.f32.mrf.mxu0 }
 0x172   : > { %v1433_v46 = vadd.f32 %v1812_v42, %v1424_v43 }
 0x173   : > { %v1420_v47 = vpop.f32.mrf.mxu0 }
 0x174   : > { %v1437_v48 = vmul.f32 0.2, %v1433_v46  ;;  %v1425_v49 = vadd.f32 %v1420_v47, %v1309_v45  ;;  %vm1435_vm3 = vcmp.ge.f32.partialorder %v1433_v46, 0.0 }
 0x175   : > { %v2084_v50 = vpop.f32.mrf.mxu0 }
 0x176   : > { %v1434_v51 = vadd.f32 %v1812_v42, %v1425_v49  ;;  %v1439_v52 = vsel %vm1435_vm3, %v1433_v46, %v1437_v48 }
 0x177   : > { %v1441_v55 = vmul.f32 1.4142135, %v1439_v52 }
 0x178   : > { %vm1436_vm4 = vcmp.ge.f32.partialorder %v1434_v51, 0.0  ;;  %v1438_v53 = vmul.f32 0.2, %v1434_v51 }
 0x17a   : > { %v1440_v54 = vsel %vm1436_vm4, %v1434_v51, %v1438_v53 }
 0x17b   : > { %v1442_v56 = vmul.f32 1.4142135, %v1440_v54 }
 0x17d   : > { %v1822_v57 = vpack.c.bf16 %v1442_v56, %v1441_v55 }
 0x17f   : > { %1823 = vst [vmem:[%s342_s7] sm:$0xff] %v1822_v57  }
 0x180 PF: > { %s15_s22 = sadd.s32 1, %s2252_s22   ;;  %s2724_s18 = smov %s2244_s20 }
 0x181   : > { %p12_p10 = scmp.ge.s32.totalorder %s15_s22, 34   ;;  %s2725_s19 = smov %s2248_s21 }
 0x182   : > { %s2726_s20 = smov %s2729_s23  ;;  %s2727_s21 = smov %s2733_s24 }
 0x183   :  { %14 = sbr.rel (!%p12_p10) target bundleno = 3 (0x3), region = 84 }

// kernel: resblock_forward.3
= control target key start
LH: loop header
LB: loop body
LE: loop exit
PB: predicated region body
PF: predicated region fallthrough
CT: control target
= control target key end

     0   :  { %s2951_s27 = smov 0   ;;  %s2953_s28 = smov 0   ;;  %s3662_s0 = inlined_call_operand.vmem [shape: bf16[2,20,20,128], index: 0, kind: input, shape index: {}, may-alias: {0,1,2}]   ;;  %s3663_s1 = inlined_call_operand.vmem [shape: bf16[2,20,20,128], index: 1, kind: input, shape index: {}, may-alias: {0,1,2}]   ;;  %s3664_s2 = inlined_call_operand.vmem [shape: bf16[2,20,20,128], index: 2, kind: input, shape index: {}, may-alias: {0,1,2}]   ;;  %s3665_s3 = inlined_call_operand.vmem [shape: bf16[2,18,18,128], index: 3, kind: input, shape index: {}, may-alias: {3,4}]   ;;  %s3666_s4 = inlined_call_operand.vmem [shape: bf16[2,18,18,128], index: 4, kind: input, shape index: {}, may-alias: {3,4}]   ;;  %s3667_s5 = inlined_call_operand.vmem [shape: bf16[3,3,128,128], index: 5, kind: input, shape index: {}]   ;;  %s3668_s6 = inlined_call_operand.vmem [shape: f32[1,128], index: 6, kind: input, shape index: {}]   ;;  %s3669_s7 = inlined_call_operand.vmem [shape: bf16[128,128], index: 7, kind: input, shape index: {}]   ;;  %s3670_s8 = inlined_call_operand.vmem [shape: f32[2,8,8,128], index: 8, kind: output, shape index: {}]  }
   0x1   :  { %s2955_s29 = smov 0   ;;  %s2957_s30 = smov 0  }
   0x2   :  { %s2959_s9 = smov 0  }
   0x3 LB: > { %s27_s10 = sadd.s32 1, %s2894_s29  ;;  %s30_s11 = sadd.s32 1, %s2898_s30  ;;  %s2902_s9 = sphi %s2959_s9, %s18_s9   ;;  %s2898_s30 = sphi %s2957_s30, %s3675_s30   ;;  %s2894_s29 = sphi %s2955_s29, %s3674_s29   ;;  %s2890_s28 = sphi %s2953_s28, %s3673_s28   ;;  %s2886_s27 = sphi %s2951_s27, %s3672_s27  }
   0x4   : > { %p28_p0 = scmp.ge.s32.totalorder %s27_s10, 8  ;;  %p2187_p1 = scmp.ge.s32.totalorder %s2902_s9, 1 }
   0x5   : > { %p368_p2 = scmp.lt.s32.totalorder %s2902_s9, 17 }
   0x6   : > { %s3677_s10 = smov (%p28_p0, %s27_s10), 0  ;;  %s3679_s11 = smov (!%p28_p0, %s30_s11), %s2898_s30 }
   0x7   : > { %p369_p3 = pnand %p2187_p1, %p368_p2  ;;  %p32_p4 = scmp.ge.s32.totalorder %s3679_s11, 2 }
   0x8   : > { %s2999_s18 = sshll.u32 (!%p369_p3), %s2886_s27, 1  ;;  %p454_p5 = scmp.lt.s32.totalorder (!%p369_p3), %s2890_s28, 1 }
   0x9   : > { %s3681_s11 = smov (%p32_p4, %s3679_s11), 0  ;;  %372 = sbr.rel (%p369_p3) target bundleno = 387 (0x183), region = 52 }
   0xa   : > { %p456_p6 = scmp.lt.s32.totalorder (!%p369_p3), %s2999_s18, 19  ;;  %s3026_s13 = sadd.s32 (!%p369_p3), 2, %s2999_s18 }
   0xb   : > { %p468_p7 = scmp.lt.s32.totalorder (!%p369_p3), %s3026_s13, 19  ;;  %s2434_s25 = sadd.s32 (!%p369_p3), 4, %s2999_s18 }
   0xc   : > { %p3108_p8 = scmp.lt.s32.totalorder (!%p369_p3), %s2434_s25, 19  ;;  %p493_p9 = scmp.lt.s32.totalorder (!%p369_p3), %s2999_s18, 17 }
   0xd   : > { %p505_p10 = scmp.lt.s32.totalorder (!%p369_p3), %s3026_s13, 17  ;;  %p516_p11 = scmp.lt.s32.totalorder (!%p369_p3), %s2886_s27, 7 }
   0xe   : > { %v2784_v0 = vld [vmem:[%s3667_s5 + $0x78] sm:$0xff]   ;;  %v2904_v1 = vmov 0.0   ;;  %v2786_v3 = vld [vmem:[%s3667_s5 + $0x70] sm:$0xff]   ;;  %vm2905_vm0 = vmmov 0   ;;  %s3683_s28 = smov (!%p454_p5, %s2890_s28), 1  ;;  %v2788_v5 = vld [vmem:[%s3667_s5 + $0x68] sm:$0xff]  }
   0xf   : > { %2535 = vmatprep.subr.bf16.mxu0 %v2904_v1  ;;  %2555 = vmatprep.subr.bf16.mxu1 %v2904_v1  ;;  %v2785_v2 = vld [vmem:[%s3667_s5 + $0x38] sm:$0xff]   ;;  %v2787_v4 = vld [vmem:[%s3667_s5 + $0x30] sm:$0xff]   ;;  %s457_s23 = scalar_select %p456_p6, %s2999_s18, 19  ;;  %v2789_v6 = vld [vmem:[%s3667_s5 + $0x28] sm:$0xff]   ;;  %vm640_vm1 = vcmask 1040384   ;;  %vm620_vm2 = vcmask 1046528  }
  0x10   : > { %2536 = vmatpush3.bf16.msra.mxu0 %v2784_v0  ;;  %2551 = vmatprep.mubr.msk.bf16.mxu0 %vm2905_vm0, %v2904_v1  ;;  %s3022_s26 = smul.u32 60, %s3683_s28  ;;  %v2790_v7 = vld [vmem:[%s3667_s5 + $0x60] sm:$0xff]   ;;  %v2792_v9 = vld [vmem:[%s3667_s5 + $0x58] sm:$0xff]   ;;  %v2794_v11 = vld [vmem:[%s3667_s5 + $0x50] sm:$0xff]   ;;  %s3685_s25 = smov (!%p3108_p8, %s2434_s25), 19  ;;  %vm608_vm3 = vcmask 1045504  }
  0x11   : > { %2556 = vmatpush3.bf16.msra.mxu1 %v2785_v2  ;;  %2537 = vmatprep.subr.bf16.mxu0 %v2904_v1  ;;  %s2735_s12 = smul.u32 3, %s457_s23  ;;  %v2791_v8 = vld [vmem:[%s3667_s5 + $0x20] sm:$0xff]   ;;  %v2793_v10 = vld [vmem:[%s3667_s5 + $0x18] sm:$0xff]   ;;  %v2795_v14 = vld [vmem:[%s3667_s5 + $0x10] sm:$0xff]   ;;  %vm632_vm4 = vcmask 1044480   ;;  %s3687_s18 = smov (!%p493_p9, %s2999_s18), 17 }
  0x12   : > { %2557 = vmatprep.subr.bf16.mxu1 %v2904_v1  ;;  %2571 = vmatprep.mubr.msk.bf16.mxu1 %vm2905_vm0, %v2904_v1  ;;  %s469_s24 = scalar_select %p468_p7, %s3026_s13, 19  ;;  %v2796_v32 = vld [vmem:[%s3667_s5 + $0x48] sm:$0xff]   ;;  %v2798_v58 = vld [vmem:[%s3667_s5 + $0x40] sm:$0xff]  }
  0x13   : > { %s460_s16 = sadd.s32 %s3022_s26, %s2735_s12  ;;  %v2797_v45 = vld [vmem:[%s3667_s5 + $0x8] sm:$0xff]   ;;  %v2799_v63 = vld [vmem:[%s3667_s5] sm:$0xff]   ;;  %s2738_s14 = smul.u32 3, %s3685_s25 }
  0x14   : > { %2538 = vmatpush3.bf16.msra.mxu0 %v2786_v3  ;;  %s2189_s20 = sshll.u32 %s460_s16, 2  ;;  %s2737_s16 = smul.u32 3, %s469_s24 }
  0x15   : > { %2558 = vmatpush3.bf16.msra.mxu1 %v2787_v4  ;;  %2539 = vmatprep.subr.bf16.mxu0 %v2904_v1  ;;  %s462_s23 = scalar_lea.vmem %s3662_s0, %s2189_s20  ;;  %s3689_s13 = smov (!%p505_p10, %s3026_s13), 17 }
  0x16   : > { %2559 = vmatprep.subr.bf16.mxu1 %v2904_v1  ;;  %v3053_v12 = vld [vmem:[%s462_s23] ss:$12 sps:$4 sm:$0xff]   ;;  %v524_v13 = vld [vmem:[%s462_s23 + $0x4] sm:$0x1]  ;;  %s472_s22 = sadd.s32 %s2737_s16, %s3022_s26  ;;  %v527_v17 = vld [vmem:[%s462_s23 + $0x4] sm:$0xe] }
  0x17   : > { %v525_v15 = vunpack.c.l.bf16 %v3053_v12  ;;  %v526_v16 = vunpack.c.l.bf16 %v524_v13  ;;  %v528_v18 = vld [vmem:[%s462_s23 + $0x8] sm:$0x3]  ;;  %v3060_v19 = vld [vmem:[%s462_s23 + $0x10] sm:$0x1]  ;;  %s2191_s24 = sshll.u32 %s472_s22, 2  ;;  %v534_v20 = vunpack.c.h.bf16 %v3053_v12  ;;  %v529_v26 = vunpack.c.l.bf16 %v527_v17  ;;  %s2741_s20 = smul.u32 3, %s3689_s13 }
  0x18   : > { %2540 = vmatpush3.bf16.msra.mxu0 %v2788_v5  ;;  %v535_v21 = vunpack.c.l.bf16 %v3060_v19  ;;  %v3065_v22 = vld [vmem:[%s462_s23 + $0x10] sm:$0xe]  ;;  %v3067_v23 = vld [vmem:[%s462_s23 + $0x14] sm:$0x3]  ;;  %s474_s15 = scalar_lea.vmem %s3663_s1, %s2191_s24  ;;  %v530_v27 = vunpack.c.l.bf16 %v528_v18  ;;  %s3691_s27 = smov (!%p516_p11, %s2886_s27), 7 }
  0x19   : > { %2560 = vmatpush3.bf16.msra.mxu1 %v2789_v6  ;;  %2541 = vmatprep.subr.bf16.mxu0 %v2904_v1  ;;  %v574_v24 = vmul.f32 0.125, %v525_v15  ;;  %v575_v25 = vmul.f32 0.125, %v526_v16  ;;  %v538_v28 = vunpack.c.l.bf16 %v3065_v22  ;;  %v3075_v29 = vld [vmem:[%s474_s15] ss:$12 sps:$4 sm:$0xff]   ;;  %v3077_v30 = vld [vmem:[%s474_s15 + $0x4] sm:$0x1]  ;;  %v539_v33 = vunpack.c.l.bf16 %v3067_v23 }
  0x1a   : > { %2561 = vmatprep.subr.bf16.mxu1 %v2904_v1  ;;  %v3079_v31 = vld [vmem:[%s474_s15 + $0x4] sm:$0xe]  ;;  %v542_v34 = vunpack.c.l.bf16 %v3075_v29  ;;  %v543_v35 = vunpack.c.l.bf16 %v3077_v30  ;;  %v3087_v36 = vld [vmem:[%s474_s15 + $0x8] sm:$0x3]  ;;  %v3089_v37 = vld [vmem:[%s474_s15 + $0x10] sm:$0x1]  ;;  %v551_v38 = vunpack.c.h.bf16 %v3075_v29 }
  0x1b   : > { %v546_v39 = vunpack.c.l.bf16 %v3079_v31  ;;  %v552_v40 = vunpack.c.l.bf16 %v3089_v37  ;;  %v3094_v41 = vld [vmem:[%s474_s15 + $0x10] sm:$0xe]  ;;  %v3096_v42 = vld [vmem:[%s474_s15 + $0x14] sm:$0x3]  ;;  %v576_v43 = vmul.f32 0.375, %v534_v20  ;;  %v577_v44 = vmul.f32 0.375, %v535_v21  ;;  %s485_s15 = sadd.s32 %s2738_s14, %s3022_s26 }
  0x1c   : > { %2542 = vmatpush3.bf16.msra.mxu0 %v2790_v7  ;;  %v547_v46 = vunpack.c.l.bf16 %v3087_v36  ;;  %v555_v47 = vunpack.c.l.bf16 %v3094_v41  ;;  %v3116_v48 = vmul.f32 0.375, %v542_v34  ;;  %v3120_v49 = vmul.f32 0.375, %v543_v35  ;;  %s2193_s25 = sshll.u32 %s485_s15, 2  ;;  %v2800_v23 = vld [vmem:[%s3667_s5 + $0xb8] sm:$0xff]   ;;  %v2813_v31 = vld [vmem:[%s3667_s5 + $0xc8] sm:$0xff]   ;;  %s2739_s14 = smul.u32 3, %s3687_s18 }
  0x1d   : > { %2562 = vmatpush3.bf16.msra.mxu1 %v2791_v8  ;;  %2543 = vmatprep.subr.bf16.mxu0 %v2904_v1  ;;  %v556_v50 = vunpack.c.l.bf16 %v3096_v42  ;;  %v578_v51 = vadd.f32 %v576_v43, %v574_v24  ;;  %v579_v52 = vadd.f32 %v577_v44, %v575_v25  ;;  %v584_v53 = vmul.f32 0.125, %v551_v38  ;;  %s3180_s16 = scalar_lea.vmem %s3664_s2, %s2193_s25  ;;  %s2740_s15 = smul.u32 54, %s3683_s28 }
  0x1e   : > { %2563 = vmatprep.subr.bf16.mxu1 %v2904_v1  ;;  %v585_v54 = vmul.f32 0.125, %v552_v40  ;;  %v588_v55 = vmul.f32 0.125, %v529_v26  ;;  %v589_v56 = vmul.f32 0.125, %v530_v27  ;;  %v590_v57 = vmul.f32 0.375, %v538_v28  ;;  %v3215_v41 = vld [vmem:[%s3180_s16 + $0x8] sm:$0x3] }
  0x1f   : > { %v582_v59 = vadd.f32 %v3116_v48, %v578_v51  ;;  %v583_v60 = vadd.f32 %v3120_v49, %v579_v52  ;;  %v591_v61 = vmul.f32 0.375, %v539_v33  ;;  %v3139_v62 = vmul.f32 0.375, %v546_v39  ;;  %s509_s26 = sadd.s32 %s2741_s20, %s2740_s15 }
  0x20   : > { %2544 = vmatpush3.bf16.msra.mxu0 %v2792_v9  ;;  %v592_v0 = vadd.f32 %v590_v57, %v588_v55  ;;  %v3151_v2 = vmul.f32 0.375, %v547_v46  ;;  %v598_v3 = vmul.f32 0.125, %v555_v47  ;;  %v599_v7 = vmul.f32 0.125, %v556_v50  ;;  %s2197_s19 = sshll.u32 %s509_s26, 2 }
  0x21   : > { %2564 = vmatpush3.bf16.msra.mxu1 %v2793_v10  ;;  %2545 = vmatprep.subr.bf16.mxu0 %v2904_v1  ;;  %v586_v4 = vadd.f32 %v584_v53, %v582_v59  ;;  %v587_v5 = vadd.f32 %v585_v54, %v583_v60  ;;  %v593_v6 = vadd.f32 %v591_v61, %v589_v56  ;;  %v998_v57 = vmul.f32 0.125, %v538_v28  ;;  %v3185_v61 = vld [vmem:[%s3180_s16 + $0x4] sm:$0x1] }
  0x22   : > { %2565 = vmatprep.subr.bf16.mxu1 %v2904_v1  ;;  %v596_v8 = vadd.f32 %v3139_v62, %v592_v0  ;;  %v999_v59 = vmul.f32 0.125, %v539_v33  ;;  %v987_v22 = vmul.f32 0.125, %v535_v21  ;;  %v3198_v12 = vmul.f32 0.375, %v555_v47 }
  0x23   : > { %v597_v9 = vadd.f32 %v3151_v2, %v593_v6  ;;  %v616_v10 = vmul.f32 0.375, %v586_v4  ;;  %v3161_v13 = vmul.f32 0.375, %v587_v5  ;;  %v603_v43 = vmul.f32 0.125, %v587_v5  ;;  %v3203_v5 = vld [vmem:[%s3180_s16] ss:$12 sps:$4 sm:$0xff]  }
  0x24   : > { %2546 = vmatpush3.bf16.msra.mxu0 %v2794_v11  ;;  %v600_v11 = vadd.f32 %v598_v3, %v596_v8  ;;  %v602_v53 = vmul.f32 0.125, %v586_v4  ;;  %v1001_v8 = vadd.f32 %v999_v59, %v3151_v2  ;;  %v3223_v2 = vmul.f32 0.375, %v552_v40  ;;  %v2801_v40 = vld [vmem:[%s3667_s5 + $0xf8] sm:$0xff]  }
  0x25   : > { %2566 = vmatpush3.bf16.msra.mxu1 %v2795_v14  ;;  %2547 = vmatprep.subr.bf16.mxu0 %v2904_v1  ;;  %v601_v14 = vadd.f32 %v599_v7, %v597_v9  ;;  %v641_v15 = vrot.slane %v616_v10, 7  ;;  %v642_v18 = vrot.slane %v3161_v13, 7  ;;  %v621_v28 = vrot.slane %v616_v10, 1  ;;  %v3212_v10 = vld [vmem:[%s3180_s16 + $0x4] sm:$0xe] }
  0x26   : > { %2567 = vmatprep.subr.bf16.mxu1 %v2904_v1  ;;  %v604_v16 = vmul.f32 0.375, %v600_v11  ;;  %v628_v17 = vmul.f32 0.125, %v600_v11  ;;  %v622_v0 = vrot.slane %v3161_v13, 1  ;;  %v1000_v7 = vadd.f32 %v998_v57, %v3139_v62 }
  0x27   : > { %v3165_v24 = vmul.f32 0.375, %v601_v14  ;;  %v3167_v25 = vmul.f32 0.125, %v601_v14  ;;  %v643_v26 = vsel %vm640_vm1, %v641_v15, %v642_v18  ;;  %v3209_v9 = vmul.f32 0.375, %v556_v50 }
  0x28   : > { %2548 = vmatpush3.bf16.msra.mxu0 %v2796_v32  ;;  %v646_v27 = vadd.f32 %v641_v15, %v628_v17  ;;  %v648_v32 = vrot.slane %v604_v16, 1  ;;  %v609_v60 = vrot.slane %v604_v16, 2  ;;  %v633_v4 = vrot.slane %v628_v17, 3  ;;  %v2802_v17 = vld [vmem:[%s3667_s5 + $0xb0] sm:$0xff]  }
  0x29   : > { %2568 = vmatpush3.bf16.msra.mxu1 %v2797_v45  ;;  %2549 = vmatprep.subr.bf16.mxu0 %v2904_v1  ;;  %v647_v44 = vadd.f32 %v643_v26, %v3167_v25  ;;  %v649_v45 = vrot.slane %v3165_v24, 1  ;;  %v610_v54 = vrot.slane %v3165_v24, 2  ;;  %v634_v21 = vrot.slane %v3167_v25, 3 }
  0x2a   : > { %2569 = vmatprep.subr.bf16.mxu1 %v2904_v1  ;;  %v563_v13 = vunpack.c.l.bf16 %v3212_v10  ;;  %v560_v14 = vunpack.c.l.bf16 %v3185_v61  ;;  %v989_v62 = vadd.f32 %v987_v22, %v3120_v49  ;;  %v564_v42 = vunpack.c.l.bf16 %v3215_v41  ;;  %v2816_v61 = vld [vmem:[%s3667_s5 + $0x138] sm:$0xff]   ;;  %v2815_v10 = vld [vmem:[%s3667_s5 + $0xc0] sm:$0xff]  }
  0x2b   : > { %v650_v51 = vsel %vm620_vm2, %v648_v32, %v649_v45  ;;  %v654_v52 = vadd.f32 %v649_v45, %v647_v44  ;;  %v611_v3 = vsel %vm608_vm3, %v609_v60, %v610_v54  ;;  %v635_v11 = vsel %vm632_vm4, %v633_v4, %v634_v21  ;;  %v2804_v44 = vld [vmem:[%s3667_s5 + $0xa8] sm:$0xff]  }
  0x2c   : > { %2550 = vmatpush3.bf16.msra.mxu0 %v2798_v58  ;;  %v653_v55 = vadd.f32 %v650_v51, %v646_v27  ;;  %v614_v19 = vadd.f32 %v611_v3, %v602_v53  ;;  %v3229_v15 = vmul.f32 0.375, %v551_v38  ;;  %v559_v37 = vunpack.c.l.bf16 %v3203_v5  ;;  %v2803_v51 = vld [vmem:[%s3667_s5 + $0xf0] sm:$0xff]  }
  0x2d   : > { %2570 = vmatpush3.bf16.msra.mxu1 %v2799_v63  ;;  %2575 = vmatprep.subr.bf16.mxu0 %v2904_v1  ;;  %v656_v56 = vadd.f32 %v654_v52, %v603_v43  ;;  %v986_v63 = vmul.f32 0.125, %v534_v20  ;;  %v623_v20 = vsel %vm620_vm2, %v621_v28, %v622_v0  ;;  %v1004_v38 = vadd.f32 %v3198_v12, %v1000_v7  ;;  %v2808_v28 = vld [vmem:[%s3667_s5 + $0x98] sm:$0xff]   ;;  %v2810_v3 = vld [vmem:[%s3667_s5 + $0x90] sm:$0xff]  }
  0x2e   : > { %2595 = vmatprep.subr.bf16.mxu1 %v2904_v1  ;;  %v655_v58 = vadd.f32 %v653_v55, %v602_v53  ;;  %v626_v47 = vadd.f32 %v623_v20, %v614_v19  ;;  %v1006_v49 = vmul.f32 0.125, %v563_v13  ;;  %v1007_v18 = vmul.f32 0.125, %v564_v42  ;;  %v2805_v55 = vld [vmem:[%s3667_s5 + $0xe8] sm:$0xff]   ;;  %v2809_v20 = vld [vmem:[%s3667_s5 + $0xd8] sm:$0xff]  }
  0x2f   : > { %v988_v50 = vadd.f32 %v986_v63, %v3116_v48  ;;  %v1005_v48 = vadd.f32 %v3209_v9, %v1001_v8  ;;  %v615_v25 = vadd.f32 %v610_v54, %v603_v43  ;;  %v993_v26 = vadd.f32 %v3223_v2, %v989_v62  ;;  %v2807_v63 = vld [vmem:[%s3667_s5 + $0xe0] sm:$0xff]   ;;  %v2812_v62 = vld [vmem:[%s3667_s5 + $0x88] sm:$0xff]  }
  0x30   : > { %v674_v33 = vpack.c.bf16 %v656_v56, %v655_v58  ;;  %v638_v16 = vadd.f32 %v635_v11, %v626_v47  ;;  %v995_v27 = vmul.f32 0.125, %v560_v14  ;;  %v994_v45 = vmul.f32 0.125, %v559_v37  ;;  %v2806_v56 = vld [vmem:[%s3667_s5 + $0xa0] sm:$0xff]   ;;  %v2811_v11 = vld [vmem:[%s3667_s5 + $0xd0] sm:$0xff]  }
  0x31   : > { %v992_v32 = vadd.f32 %v3229_v15, %v988_v50  ;;  %v1008_v43 = vadd.f32 %v1006_v49, %v1004_v38  ;;  %v1009_v52 = vadd.f32 %v1007_v18, %v1005_v48  ;;  %v627_v54 = vadd.f32 %v622_v0, %v615_v25  ;;  %v2814_v18 = vld [vmem:[%s3667_s5 + $0x80] sm:$0xff]  }
  0x32   : > { %v693_v6 = vrot.slane %v674_v33, 1  ;;  %v657_v24 = vpack.c.bf16 %v638_v16, %v638_v16  ;;  %v3261_v53 = vadd.f32 %v995_v27, %v993_v26  ;;  %v1393_v4 = vmul.f32 0.125, %v542_v34 }
  0x33   : > { %v996_v57 = vadd.f32 %v994_v45, %v992_v32  ;;  %v3270_v58 = vmul.f32 0.375, %v1008_v43  ;;  %v3272_v59 = vmul.f32 0.375, %v1009_v52  ;;  %v639_v60 = vadd.f32 %v634_v21, %v627_v54 }
  0x34   : > { %2552 = vmatmul.mubr.bf16.vlgmr.msra.gmra.mxu0 %v693_v6  ;;  %2572 = vmatmul.mubr.bf16.vlgmr.msra.gmra.mxu1 %v657_v24  ;;  %v3279_v22 = vmul.f32 0.375, %v3261_v53  ;;  %v3301_v7 = vmul.f32 0.125, %v1008_v43  ;;  %v3308_v8 = vmul.f32 0.125, %v1009_v52  ;;  %v1394_v47 = vmul.f32 0.125, %v543_v35  ;;  %v2209_v43 = vld [vmem:[%s3180_s16 + $0x10] sm:$0x1] }
  0x35   : > { %2576 = vmatpush3.bf16.msra.mxu0 %v2800_v23  ;;  %2591 = vmatprep.mubr.msk.bf16.mxu0 %vm2905_vm0, %v2904_v1  ;;  %v3284_v0 = vmul.f32 0.375, %v996_v57  ;;  %v1016_v23 = vrot.slane %v3270_v58, 2  ;;  %v1017_v33 = vrot.slane %v3272_v59, 2  ;;  %v871_v19 = vpack.c.bf16 %v639_v60, %v638_v16  ;;  %v2210_v52 = vld [vmem:[%s3180_s16 + $0x10] sm:$0xe] }
  0x36   : > { %2577 = vmatprep.subr.bf16.mxu0 %v2904_v1  ;;  %2596 = vmatpush3.bf16.msra.mxu1 %v2801_v40  ;;  %v1028_v21 = vrot.slane %v3279_v22, 1  ;;  %v3299_v6 = vmul.f32 0.125, %v996_v57  ;;  %v1397_v16 = vmul.f32 0.375, %v559_v37  ;;  %v568_v38 = vunpack.c.h.bf16 %v3203_v5  ;;  %v2818_v60 = vld [vmem:[%s3667_s5 + $0x130] sm:$0xff]  }
  0x37   : > { %2597 = vmatprep.subr.bf16.mxu1 %v2904_v1  ;;  %2611 = vmatprep.mubr.msk.bf16.mxu1 %vm2905_vm0, %v2904_v1  ;;  %v1018_v29 = vsel %vm608_vm3, %v1016_v23, %v1017_v33  ;;  %v1027_v34 = vrot.slane %v3284_v0, 1  ;;  %v892_v50 = vshll.u32 %v871_v19, 16  ;;  %v1038_v35 = vrot.slane %v3301_v7, 3 }
  0x38   : > { %v1021_v40 = vadd.f32 %v1018_v29, %v3299_v6  ;;  %v1039_v48 = vrot.slane %v3308_v8, 3  ;;  %v1405_v37 = vmul.f32 0.125, %v546_v39  ;;  %v890_v5 = vshrl.u32 %v871_v19, 16 }
  0x39   : > { %2578 = vmatpush3.bf16.msra.mxu0 %v2802_v17  ;;  %v1395_v17 = vadd.f32 %v1393_v4, %v3229_v15  ;;  %v1029_v30 = vsel %vm620_vm2, %v1027_v34, %v1028_v21  ;;  %v1406_v15 = vmul.f32 0.125, %v547_v46  ;;  %v894_v49 = vrot.slane %v892_v50, 1 }
  0x3a   : > { %2579 = vmatprep.subr.bf16.mxu0 %v2904_v1  ;;  %2598 = vmatpush3.bf16.msra.mxu1 %v2803_v51  ;;  %v1032_v24 = vadd.f32 %v1029_v30, %v1021_v40  ;;  %v1401_v26 = vmul.f32 0.125, %v568_v38  ;;  %v1040_v36 = vsel %vm632_vm4, %v1038_v35, %v1039_v48  ;;  %v1398_v39 = vmul.f32 0.375, %v560_v14 }
  0x3b   : > { %2599 = vmatprep.subr.bf16.mxu1 %v2904_v1  ;;  %v1399_v25 = vadd.f32 %v1397_v16, %v1395_v17  ;;  %v1396_v46 = vadd.f32 %v1394_v47, %v3223_v2  ;;  %v1407_v27 = vadd.f32 %v1405_v37, %v3198_v12  ;;  %v895_v32 = vor.u32 %v894_v49, %v890_v5 }
  0x3c   : > { %v1408_v45 = vadd.f32 %v1406_v15, %v3209_v9  ;;  %v3354_v14 = vadd.f32 %v1040_v36, %v1032_v24  ;;  %v1410_v12 = vmul.f32 0.375, %v564_v42  ;;  %v3363_v9 = vmul.f32 0.125, %v3261_v53  ;;  %v2817_v42 = vld [vmem:[%s3667_s5 + $0x178] sm:$0xff]  }
  0x3d   : > { %2580 = vmatpush3.bf16.msra.mxu0 %v2804_v44  ;;  %v1409_v44 = vmul.f32 0.375, %v563_v13  ;;  %v1403_v51 = vadd.f32 %v1401_v26, %v1399_v25  ;;  %v1045_v13 = vrot.slane %v3284_v0, 7  ;;  %v1046_v2 = vrot.slane %v3279_v22, 7  ;;  %v2822_v26 = vld [vmem:[%s3667_s5 + $0x120] sm:$0xff]  }
  0x3e   : > { %2581 = vmatprep.subr.bf16.mxu0 %v2904_v1  ;;  %2600 = vmatpush3.bf16.msra.mxu1 %v2805_v55  ;;  %v1400_v41 = vadd.f32 %v1398_v39, %v1396_v46  ;;  %v569_v54 = vunpack.c.l.bf16 %v2209_v43  ;;  %v2211_v55 = vld [vmem:[%s3180_s16 + $0x14] sm:$0x3]  ;;  %v1061_v53 = vpack.c.bf16 %v3354_v14, %v3354_v14  ;;  %v1052_v23 = vrot.slane %v3270_v58, 1  ;;  %v2821_v46 = vld [vmem:[%s3667_s5 + $0x168] sm:$0xff]   ;;  %v2823_v22 = vld [vmem:[%s3667_s5 + $0x160] sm:$0xff]   ;;  %s497_s16 = sadd.s32 %s2740_s15, %s2739_s14 }
  0x3f   : > { %2601 = vmatprep.subr.bf16.mxu1 %v2904_v1  ;;  %v1411_v57 = vadd.f32 %v1409_v44, %v1407_v27  ;;  %v1430_v0 = vmul.f32 0.375, %v1403_v51  ;;  %v1417_v34 = vmul.f32 0.125, %v1403_v51  ;;  %v2819_v58 = vld [vmem:[%s3667_s5 + $0x170] sm:$0xff]   ;;  %v1022_v35 = vadd.f32 %v1017_v33, %v3363_v9  ;;  %s2195_s24 = sshll.u32 %s497_s16, 2 }
  0x40   : > { %v1402_v4 = vmul.f32 0.125, %v569_v54  ;;  %v1047_v37 = vsel %vm640_vm1, %v1045_v13, %v1046_v2  ;;  %v1050_v27 = vadd.f32 %v1045_v13, %v3301_v7  ;;  %v2824_v13 = vld [vmem:[%s3667_s5 + $0x118] sm:$0xff]   ;;  %s499_s18 = scalar_lea.vmem %s3665_s3, %s2195_s24  ;;  %s3532_s24 = scalar_lea.vmem %s3666_s4, %s2197_s19 }
  0x41   : > { %2582 = vmatpush3.bf16.msra.mxu0 %v2806_v56  ;;  %v572_v56 = vunpack.c.l.bf16 %v2210_v52  ;;  %v1434_v50 = vrot.slane %v1430_v0, 1  ;;  %v1452_v16 = vrot.slane %v1430_v0, 7  ;;  %v1051_v2 = vadd.f32 %v1047_v37, %v3308_v8  ;;  %v2826_v0 = vld [vmem:[%s3667_s5 + $0x110] sm:$0xff]   ;;  %v2837_v37 = vld [vmem:[%s3667_s5 + $0x1e8] sm:$0xff]  }
  0x42   : > { %2583 = vmatprep.subr.bf16.mxu0 %v2904_v1  ;;  %2602 = vmatpush3.bf16.msra.mxu1 %v2807_v63  ;;  %v573_v63 = vunpack.c.l.bf16 %v2211_v55  ;;  %v1404_v47 = vadd.f32 %v1402_v4, %v1400_v41  ;;  %v1033_v43 = vadd.f32 %v1028_v21, %v1022_v35  ;;  %v2838_v35 = vld [vmem:[%s3667_s5 + $0x1a0] sm:$0xff]  }
  0x43   : > { %2603 = vmatprep.subr.bf16.mxu1 %v2904_v1  ;;  %v1413_v19 = vmul.f32 0.125, %v572_v56 }
  0x44   : > { %v1414_v29 = vmul.f32 0.125, %v573_v63  ;;  %v1431_v40 = vmul.f32 0.375, %v1404_v47  ;;  %v1418_v30 = vmul.f32 0.125, %v1404_v47 }
  0x45   : > { %2584 = vmatpush3.bf16.msra.mxu0 %v2808_v28  ;;  %v1412_v28 = vadd.f32 %v1410_v12, %v1408_v45 }
  0x46   : > { %2585 = vmatprep.subr.bf16.mxu0 %v2904_v1  ;;  %2604 = vmatpush3.bf16.msra.mxu1 %v2809_v20  ;;  %v2820_v20 = vld [vmem:[%s3667_s5 + $0x128] sm:$0xff]   ;;  %v1453_v25 = vrot.slane %v1431_v40, 7 }
  0x47   : > { %2605 = vmatprep.subr.bf16.mxu1 %v2904_v1 }
  0x48   : > { %v1454_v44 = vsel %vm640_vm1, %v1452_v16, %v1453_v25  ;;  %v1817_v25 = vld [vmem:[%s499_s18 + $0x8] sm:$0x1] }
  0x49   : > { %2586 = vmatpush3.bf16.msra.mxu0 %v2810_v3  ;;  %v1053_v3 = vrot.slane %v3272_v59, 1 }
  0x4a   : > { %2587 = vmatprep.subr.bf16.mxu0 %v2904_v1  ;;  %2606 = vmatpush3.bf16.msra.mxu1 %v2811_v11  ;;  %v1415_v11 = vadd.f32 %v1413_v19, %v1411_v57  ;;  %v2825_v19 = vld [vmem:[%s3667_s5 + $0x158] sm:$0xff]  }
  0x4b   : > { %2607 = vmatprep.subr.bf16.mxu1 %v2904_v1  ;;  %v1054_v41 = vsel %vm620_vm2, %v1052_v23, %v1053_v3  ;;  %v1058_v63 = vadd.f32 %v1053_v3, %v1051_v2  ;;  %v1044_v23 = vadd.f32 %v1039_v48, %v1033_v43  ;;  %v2828_v48 = vld [vmem:[%s3667_s5 + $0x108] sm:$0xff]  }
  0x4c   : > { %v1419_v17 = vmul.f32 0.375, %v1415_v11  ;;  %v1441_v38 = vmul.f32 0.125, %v1415_v11  ;;  %v2832_v11 = vld [vmem:[%s3667_s5 + $0x1b8] sm:$0xff]  }
  0x4d   : > { %2588 = vmatpush3.bf16.msra.mxu0 %v2812_v62  ;;  %v1416_v62 = vadd.f32 %v1414_v29, %v1412_v28  ;;  %v1060_v8 = vadd.f32 %v1058_v63, %v3363_v9  ;;  %v2827_v29 = vld [vmem:[%s3667_s5 + $0x150] sm:$0xff]   ;;  %v2830_v9 = vld [vmem:[%s3667_s5 + $0x100] sm:$0xff]  }
  0x4e   : > { %2589 = vmatprep.subr.bf16.mxu0 %v2904_v1  ;;  %2608 = vmatpush3.bf16.msra.mxu1 %v2813_v31  ;;  %v1423_v49 = vrot.slane %v1419_v17, 2  ;;  %v1445_v24 = vrot.slane %v1441_v38, 3  ;;  %v1457_v39 = vadd.f32 %v1452_v16, %v1441_v38  ;;  %v1459_v33 = vrot.slane %v1419_v17, 1  ;;  %v2831_v16 = vld [vmem:[%s3667_s5 + $0x140] sm:$0xff]   ;;  %v2834_v17 = vld [vmem:[%s3667_s5 + $0x1b0] sm:$0xff]   ;;  %v2836_v38 = vld [vmem:[%s3667_s5 + $0x1a8] sm:$0xff]  }
  0x4f   : > { %2609 = vmatprep.subr.bf16.mxu1 %v2904_v1  ;;  %v1420_v15 = vmul.f32 0.375, %v1416_v62  ;;  %v1442_v5 = vmul.f32 0.125, %v1416_v62 }
  0x51   : > { %2590 = vmatpush3.bf16.msra.mxu0 %v2814_v18  ;;  %v1435_v18 = vrot.slane %v1431_v40, 1  ;;  %v1424_v31 = vrot.slane %v1420_v15, 2  ;;  %v1446_v36 = vrot.slane %v1442_v5, 3  ;;  %v1460_v45 = vrot.slane %v1420_v15, 1  ;;  %v2833_v40 = vld [vmem:[%s3667_s5 + $0x1f8] sm:$0xff]  }
  0x52   : > { %2615 = vmatprep.subr.bf16.mxu0 %v2904_v1  ;;  %2610 = vmatpush3.bf16.msra.mxu1 %v2815_v10  ;;  %v1458_v10 = vadd.f32 %v1454_v44, %v1442_v5  ;;  %v2840_v15 = vld [vmem:[%s3667_s5 + $0x198] sm:$0xff]   ;;  %v2839_v5 = vld [vmem:[%s3667_s5 + $0x1e0] sm:$0xff]  }
  0x53   : > { %2635 = vmatprep.subr.bf16.mxu1 %v2904_v1  ;;  %v1447_v51 = vsel %vm632_vm4, %v1445_v24, %v1446_v36  ;;  %v1429_v12 = vadd.f32 %v1424_v31, %v1418_v30  ;;  %v1461_v7 = vsel %vm620_vm2, %v1459_v33, %v1460_v45  ;;  %v2438_v24 = vld [vmem:[%s499_s18] sm:$0xff]  }
  0x54   : > { %2592 = vmatmul.mubr.bf16.vlgmr.msra.gmra.mxu0 %v895_v32  ;;  %v1436_v32 = vsel %vm620_vm2, %v1434_v50, %v1435_v18  ;;  %v1465_v54 = vadd.f32 %v1460_v45, %v1458_v10  ;;  %v1813_v33 = vld [vmem:[%s499_s18 + $0x4] sm:$0x1]  ;;  %v2439_v10 = vunpack.c.l.bf16 %v2438_v24 }
  0x55   : > { %2616 = vmatpush3.bf16.msra.mxu0 %v2816_v61  ;;  %2631 = vmatprep.mubr.msk.bf16.mxu0 %vm2905_vm0, %v2904_v1  ;;  %v1425_v61 = vsel %vm608_vm3, %v1423_v49, %v1424_v31  ;;  %v1440_v55 = vadd.f32 %v1435_v18, %v1429_v12  ;;  %v2842_v49 = vld [vmem:[%s3667_s5 + $0x190] sm:$0xff]   ;;  %v2841_v18 = vld [vmem:[%s3667_s5 + $0x1d8] sm:$0xff]   ;;  %v2846_v12 = vld [vmem:[%s3667_s5 + $0x180] sm:$0xff]   ;;  %v1815_v2 = vunpack.c.l.bf16 %v1813_v33 }
  0x56   : > { %2617 = vmatprep.subr.bf16.mxu0 %v2904_v1  ;;  %2612 = vmatmul.mubr.bf16.vlgmr.msra.gmra.mxu1 %v1061_v53  ;;  %v1428_v52 = vadd.f32 %v1425_v61, %v1417_v34  ;;  %v3429_v57 = vadd.f32 %v1465_v54, %v1418_v30  ;;  %v2835_v30 = vld [vmem:[%s3667_s5 + $0x1f0] sm:$0xff]   ;;  %v2442_v61 = vld [vmem:[%s3532_s24] sm:$0xff]   ;;  %v2853_v33 = vld [vmem:[%s3669_s7 + $0x28] sm:$0xff]  }
  0x57   : > { %2636 = vmatpush3.bf16.msra.mxu1 %v2817_v42  ;;  %2651 = vmatprep.mubr.msk.bf16.mxu1 %vm2905_vm0, %v2904_v1  ;;  %v1464_v42 = vadd.f32 %v1461_v7, %v1457_v39  ;;  %v1451_v53 = vadd.f32 %v1446_v36, %v1440_v55  ;;  %v2416_v31 = vld [vmem:[%s499_s18 + $0x14] sm:$0x1]  ;;  %v2844_v39 = vld [vmem:[%s3667_s5 + $0x188] sm:$0xff]   ;;  %v2444_v7 = vunpack.c.h.bf16 %v2442_v61 }
  0x58   : > { %2637 = vmatprep.subr.bf16.mxu1 %v2904_v1  ;;  %v1439_v21 = vadd.f32 %v1436_v32, %v1428_v52  ;;  %v2843_v36 = vld [vmem:[%s3667_s5 + $0x1d0] sm:$0xff]   ;;  %v1828_v45 = vunpack.c.l.bf16 %v2416_v31  ;;  %v2845_v55 = vld [vmem:[%s3667_s5 + $0x1c8] sm:$0xff]  }
  0x59   : > { %2618 = vmatpush3.bf16.msra.mxu0 %v2818_v60  ;;  %v3427_v56 = vadd.f32 %v1464_v42, %v1417_v34  ;;  %v1057_v60 = vadd.f32 %v1054_v41, %v1050_v27  ;;  %v1819_v27 = vunpack.c.l.bf16 %v1817_v25  ;;  %v2414_v32 = vld [vmem:[%s499_s18 + $0x10] sm:$0x1]  ;;  %v2420_v54 = vld [vmem:[%s3532_s24 + $0x14] sm:$0x1] }
  0x5a   : > { %2619 = vmatprep.subr.bf16.mxu0 %v2904_v1  ;;  %v3433_v28 = vadd.f32 %v1447_v51, %v1439_v21  ;;  %v1834_v51 = vld [vmem:[%s3532_s24 + $0x8] sm:$0x1]  ;;  %v1824_v52 = vunpack.c.l.bf16 %v2414_v32  ;;  %v2417_v42 = vld [vmem:[%s3532_s24 + $0xc] sm:$0xff]  }
  0x5b   : > { %2638 = vmatpush3.bf16.msra.mxu1 %v2819_v58  ;;  %v1575_v4 = vpack.c.bf16 %v3429_v57, %v3427_v56  ;;  %v1059_v3 = vadd.f32 %v1057_v60, %v3299_v6  ;;  %v1836_v41 = vunpack.c.l.bf16 %v1834_v51  ;;  %v1861_v21 = vmul.f32 0.125, %v1819_v27  ;;  %v2849_v56 = vld [vmem:[%s3669_s7 + $0x38] sm:$0xff]  }
  0x5c   : > { %2639 = vmatprep.subr.bf16.mxu1 %v2904_v1  ;;  %v3447_v59 = vpack.c.bf16 %v1451_v53, %v3433_v28  ;;  %v1863_v60 = vmul.f32 0.375, %v1828_v45  ;;  %v1468_v63 = vpack.c.bf16 %v3433_v28, %v3433_v28 }
  0x5d   : > { %2620 = vmatpush3.bf16.msra.mxu0 %v2820_v20  ;;  %v1278_v20 = vpack.c.bf16 %v1044_v23, %v3354_v14  ;;  %v1168_v6 = vpack.c.bf16 %v1060_v8, %v1059_v3  ;;  %v2829_v14 = vld [vmem:[%s3667_s5 + $0x148] sm:$0xff]   ;;  %v2443_v23 = vunpack.c.l.bf16 %v2442_v61  ;;  %v1844_v3 = vunpack.c.h.bf16 %v2417_v42  ;;  %v2855_v61 = vld [vmem:[%s3669_s7 + $0x20] sm:$0xff]  }
  0x5e   : > { %2621 = vmatprep.subr.bf16.mxu0 %v2904_v1  ;;  %v1845_v8 = vunpack.c.l.bf16 %v2420_v54 }
  0x5f   : > { %2640 = vmatpush3.bf16.msra.mxu1 %v2821_v46  ;;  %v1299_v34 = vshll.u32 %v1278_v20, 16  ;;  %v1187_v47 = vrot.slane %v1168_v6, 1  ;;  %v1297_v62 = vshrl.u32 %v1278_v20, 16  ;;  %v2440_v46 = vunpack.c.h.bf16 %v2438_v24 }
  0x60   : > { %2641 = vmatprep.subr.bf16.mxu1 %v2904_v1  ;;  %v1846_v20 = vmul.f32 0.125, %v2439_v10 }
  0x61   : > { %2622 = vmatpush3.bf16.msra.mxu0 %v2822_v26  ;;  %v1301_v50 = vrot.slane %v1299_v34, 1  ;;  %v2413_v26 = vld [vmem:[%s499_s18 + $0xc] sm:$0xff]   ;;  %v2847_v34 = vld [vmem:[%s3667_s5 + $0x1c0] sm:$0xff]  }
  0x62   : > { %2623 = vmatprep.subr.bf16.mxu0 %v2904_v1  ;;  %v1827_v44 = vunpack.c.h.bf16 %v2413_v26  ;;  %v1823_v43 = vunpack.c.l.bf16 %v2413_v26 }
  0x63   : > { %2642 = vmatpush3.bf16.msra.mxu1 %v2823_v22  ;;  %v1302_v58 = vor.u32 %v1301_v50, %v1297_v62  ;;  %v1860_v22 = vmul.f32 0.125, %v2440_v46  ;;  %v1594_v62 = vrot.slane %v1575_v4, 1  ;;  %v1840_v50 = vunpack.c.l.bf16 %v2417_v42 }
  0x64   : > { %2643 = vmatprep.subr.bf16.mxu1 %v2904_v1  ;;  %v1862_v53 = vmul.f32 0.375, %v1827_v44  ;;  %v1848_v6 = vmul.f32 0.375, %v1823_v43  ;;  %v2856_v44 = vld [vmem:[%s3667_s5 + $0x218] sm:$0xff]  }
  0x65   : > { %2624 = vmatpush3.bf16.msra.mxu0 %v2824_v13  ;;  %v1830_v13 = vld [vmem:[%s3532_s24 + $0x4] sm:$0x1] }
  0x66   : > { %2625 = vmatprep.subr.bf16.mxu0 %v2904_v1  ;;  %v1864_v28 = vadd.f32 %v1862_v53, %v1860_v22  ;;  %v2860_v22 = vld [vmem:[%s3667_s5 + $0x208] sm:$0xff]   ;;  %v2859_v53 = vld [vmem:[%s3669_s7 + $0x10] sm:$0xff]  }
  0x67   : > { %2644 = vmatpush3.bf16.msra.mxu1 %v2825_v19  ;;  %v1832_v19 = vunpack.c.l.bf16 %v1830_v13 }
  0x68   : > { %2645 = vmatprep.subr.bf16.mxu1 %v2904_v1 }
  0x69   : > { %2626 = vmatpush3.bf16.msra.mxu0 %v2826_v0  ;;  %v2848_v0 = vld [vmem:[%s3667_s5 + $0x238] sm:$0xff]  }
  0x6a   : > { %2627 = vmatprep.subr.bf16.mxu0 %v2904_v1 }
  0x6b   : > { %2646 = vmatpush3.bf16.msra.mxu1 %v2827_v29  ;;  %v1847_v29 = vmul.f32 0.125, %v1815_v2  ;;  %v2858_v2 = vld [vmem:[%s3667_s5 + $0x210] sm:$0xff]  }
  0x6c   : > { %2647 = vmatprep.subr.bf16.mxu1 %v2904_v1 }
  0x6d   : > { %2628 = vmatpush3.bf16.msra.mxu0 %v2828_v48  ;;  %v2418_v48 = vld [vmem:[%s3532_s24 + $0x10] sm:$0x1]  ;;  %s2198_s24 = sshll.u32 %s3683_s28, 3 }
  0x6e   : > { %2629 = vmatprep.subr.bf16.mxu0 %v2904_v1  ;;  %s519_s25 = sadd.s32 %s2198_s24, %s3691_s27 }
  0x6f   : > { %2648 = vmatpush3.bf16.msra.mxu1 %v2829_v14  ;;  %v1865_v14 = vadd.f32 %v1863_v60, %v1861_v21  ;;  %s2199_s26 = sshll.u32 %s519_s25, 3 }
  0x70   : > { %2649 = vmatprep.subr.bf16.mxu1 %v2904_v1  ;;  %s521_s13 = scalar_lea.vmem %s3670_s8, %s2199_s26 }
  0x71   : > { %2630 = vmatpush3.bf16.msra.mxu0 %v2830_v9  ;;  %v1849_v9 = vmul.f32 0.375, %v1824_v52 }
  0x72   : > { %2655 = vmatprep.subr.bf16.mxu0 %v2904_v1 }
  0x73   : > { %2650 = vmatpush3.bf16.msra.mxu1 %v2831_v16  ;;  %v1841_v16 = vunpack.c.l.bf16 %v2418_v48  ;;  %v2861_v48 = vld [vmem:[%s3669_s7 + $0x8] sm:$0xff]  }
  0x74   : > { %2632 = vmatmul.mubr.bf16.vlgmr.msra.gmra.mxu0 %v1187_v47  ;;  %2675 = vmatprep.subr.bf16.mxu1 %v2904_v1  ;;  %v1866_v47 = vmul.f32 0.375, %v2444_v7  ;;  %v2857_v7 = vld [vmem:[%s3669_s7 + $0x18] sm:$0xff]  }
  0x75   : > { %2656 = vmatpush3.bf16.msra.mxu0 %v2832_v11  ;;  %2671 = vmatprep.mubr.msk.bf16.mxu0 %vm2905_vm0, %v2904_v1  ;;  %v1867_v11 = vmul.f32 0.375, %v1836_v41  ;;  %v1857_v25 = vmul.f32 0.125, %v1841_v16 }
  0x76   : > { %2657 = vmatprep.subr.bf16.mxu0 %v2904_v1  ;;  %2652 = vmatmul.mubr.bf16.vlgmr.msra.gmra.mxu1 %v1302_v58  ;;  %v2850_v58 = vld [vmem:[%s3667_s5 + $0x230] sm:$0xff]   ;;  %v1868_v57 = vadd.f32 %v1866_v47, %v1864_v28 }
  0x77   : > { %2676 = vmatpush3.bf16.msra.mxu1 %v2833_v40  ;;  %2691 = vmatprep.mubr.msk.bf16.mxu1 %vm2905_vm0, %v2904_v1  ;;  %v1851_v40 = vadd.f32 %v1849_v9, %v1847_v29  ;;  %v1869_v4 = vadd.f32 %v1867_v11, %v1865_v14 }
  0x78   : > { %2677 = vmatprep.subr.bf16.mxu1 %v2904_v1 }
  0x79   : > { %2658 = vmatpush3.bf16.msra.mxu0 %v2834_v17  ;;  %v1850_v17 = vadd.f32 %v1848_v6, %v1846_v20  ;;  %v2863_v6 = vld [vmem:[%s3669_s7] sm:$0xff]  }
  0x7a   : > { %2659 = vmatprep.subr.bf16.mxu0 %v2904_v1 }
  0x7b   : > { %2678 = vmatpush3.bf16.msra.mxu1 %v2835_v30  ;;  %v1853_v30 = vmul.f32 0.375, %v1832_v19 }
  0x7c   : > { %2679 = vmatprep.subr.bf16.mxu1 %v2904_v1 }
  0x7d   : > { %2660 = vmatpush3.bf16.msra.mxu0 %v2836_v38  ;;  %v1852_v38 = vmul.f32 0.375, %v2443_v23  ;;  %v1855_v24 = vadd.f32 %v1853_v30, %v1851_v40  ;;  %v1704_v23 = vshrl.u32 %v3447_v59, 16 }
  0x7e   : > { %2661 = vmatprep.subr.bf16.mxu0 %v2904_v1 }
  0x7f   : > { %2680 = vmatpush3.bf16.msra.mxu1 %v2837_v37  ;;  %v1871_v37 = vmul.f32 0.125, %v1845_v8  ;;  %v1859_v46 = vadd.f32 %v1857_v25, %v1855_v24 }
  0x80   : > { %2681 = vmatprep.subr.bf16.mxu1 %v2904_v1 }
  0x81   : > { %2662 = vmatpush3.bf16.msra.mxu0 %v2838_v35  ;;  %v1870_v35 = vmul.f32 0.125, %v1844_v3  ;;  %v1873_v31 = vadd.f32 %v1871_v37, %v1869_v4  ;;  %v1885_v10 = vmul.f32 0.375, %v1859_v46  ;;  %v2862_v3 = vld [vmem:[%s3667_s5 + $0x200] sm:$0xff]  }
  0x82   : > { %2663 = vmatprep.subr.bf16.mxu0 %v2904_v1 }
  0x83   : > { %2682 = vmatpush3.bf16.msra.mxu1 %v2839_v5  ;;  %v1854_v5 = vadd.f32 %v1852_v38, %v1850_v17  ;;  %v1872_v26 = vadd.f32 %v1870_v35, %v1868_v57  ;;  %v1876_v32 = vmul.f32 0.375, %v1873_v31  ;;  %v1889_v41 = vrot.slane %v1885_v10, 1 }
  0x84   : > { %2683 = vmatprep.subr.bf16.mxu1 %v2904_v1  ;;  %v1894_v54 = vmul.f32 0.125, %v1873_v31 }
  0x85   : > { %2664 = vmatpush3.bf16.msra.mxu0 %v2840_v15  ;;  %v2852_v15 = vld [vmem:[%s3667_s5 + $0x228] sm:$0xff]   ;;  %v1875_v27 = vmul.f32 0.375, %v1872_v26  ;;  %v1893_v42 = vmul.f32 0.125, %v1872_v26 }
  0x86   : > { %2665 = vmatprep.subr.bf16.mxu0 %v2904_v1 }
  0x87   : > { %2684 = vmatpush3.bf16.msra.mxu1 %v2841_v18  ;;  %v2851_v18 = vld [vmem:[%s3669_s7 + $0x30] sm:$0xff]   ;;  %v1879_v51 = vrot.slane %v1875_v27, 1 }
  0x88   : > { %2685 = vmatprep.subr.bf16.mxu1 %v2904_v1 }
  0x89   : > { %2666 = vmatpush3.bf16.msra.mxu0 %v2842_v49  ;;  %v1856_v49 = vmul.f32 0.125, %v1840_v50 }
  0x8a   : > { %2667 = vmatprep.subr.bf16.mxu0 %v2904_v1 }
  0x8b   : > { %2686 = vmatpush3.bf16.msra.mxu1 %v2843_v36  ;;  %v2854_v36 = vld [vmem:[%s3667_s5 + $0x220] sm:$0xff]  }
  0x8c   : > { %2687 = vmatprep.subr.bf16.mxu1 %v2904_v1 }
  0x8d   : > { %2668 = vmatpush3.bf16.msra.mxu0 %v2844_v39  ;;  %v1858_v39 = vadd.f32 %v1856_v49, %v1854_v5 }
  0x8e   : > { %2669 = vmatprep.subr.bf16.mxu0 %v2904_v1 }
  0x8f   : > { %2688 = vmatpush3.bf16.msra.mxu1 %v2845_v55  ;;  %v1884_v45 = vmul.f32 0.375, %v1858_v39  ;;  %v1874_v43 = vmul.f32 0.125, %v1858_v39  ;;  %v1706_v55 = vshll.u32 %v3447_v59, 16 }
  0x90   : > { %2689 = vmatprep.subr.bf16.mxu1 %v2904_v1 }
  0x91   : > { %2670 = vmatpush3.bf16.msra.mxu0 %v2846_v12  ;;  %v1880_v12 = vrot.slane %v1876_v32, 1  ;;  %v1888_v52 = vrot.slane %v1884_v45, 1  ;;  %v1708_v19 = vrot.slane %v1706_v55, 1 }
  0x92   : > { %2695 = vmatprep.subr.bf16.mxu0 %v2904_v1 }
  0x93   : > { %2690 = vmatpush3.bf16.msra.mxu1 %v2847_v34  ;;  %v1881_v13 = vsel %vm620_vm2, %v1879_v51, %v1880_v12  ;;  %v1890_v60 = vsel %vm620_vm2, %v1888_v52, %v1889_v41  ;;  %v1709_v29 = vor.u32 %v1708_v19, %v1704_v23 }
  0x94   : > { %2672 = vmatmul.mubr.bf16.vlgmr.msra.gmra.mxu0 %v1468_v63  ;;  %2715 = vmatprep.subr.bf16.mxu1 %v2904_v1  ;;  %v1883_v21 = vadd.f32 %v1881_v13, %v1874_v43  ;;  %v1897_v63 = vrot.slane %v1893_v42, 2  ;;  %v2412_v43 = vld [vmem:[%s3668_s6] ss:$0 sm:$0xff] }
  0x95   : > { %2696 = vmatpush3.bf16.msra.mxu0 %v2848_v0  ;;  %2711 = vmatprep.mubr.msk.bf16.mxu0 %vm2905_vm0, %v2904_v1  ;;  %v1898_v0 = vrot.slane %v1894_v54, 2 }
  0x96   : > { %2697 = vmatprep.subr.bf16.mxu0 %v2904_v1  ;;  %2692 = vmatmul.mubr.bf16.vlgmr.msra.gmra.mxu1 %v1594_v62  ;;  %v1892_v8 = vadd.f32 %v1890_v60, %v1883_v21 }
  0x97   : > { %2716 = vmatpush3.bf16.msra.mxu1 %v2849_v56  ;;  %2731 = vmatprep.mubr.msk.bf16.mxu1 %vm2905_vm0, %v2904_v1  ;;  %v1899_v20 = vsel %vm608_vm3, %v1897_v63, %v1898_v0 }
  0x98   : > { %2717 = vmatprep.subr.bf16.mxu1 %v2904_v1  ;;  %v1901_v59 = vadd.f32 %v1899_v20, %v1892_v8 }
  0x99   : > { %2698 = vmatpush3.bf16.msra.mxu0 %v2850_v58 }
  0x9a   : > { %2699 = vmatprep.subr.bf16.mxu0 %v2904_v1  ;;  %v1902_v9 = vpack.c.bf16 %v1901_v59, %v1901_v59 }
  0x9b   : > { %2718 = vmatpush3.bf16.msra.mxu1 %v2851_v18 }
  0x9c   : > { %2719 = vmatprep.subr.bf16.mxu1 %v2904_v1 }
  0x9d   : > { %2700 = vmatpush3.bf16.msra.mxu0 %v2852_v15 }
  0x9e   : > { %2701 = vmatprep.subr.bf16.mxu0 %v2904_v1 }
  0x9f   : > { %2720 = vmatpush3.bf16.msra.mxu1 %v2853_v33 }
  0xa0   : > { %2721 = vmatprep.subr.bf16.mxu1 %v2904_v1 }
  0xa1   : > { %2702 = vmatpush3.bf16.msra.mxu0 %v2854_v36 }
  0xa2   : > { %2703 = vmatprep.subr.bf16.mxu0 %v2904_v1 }
  0xa3   : > { %2722 = vmatpush3.bf16.msra.mxu1 %v2855_v61 }
  0xa4   : > { %2723 = vmatprep.subr.bf16.mxu1 %v2904_v1 }
  0xa5   : > { %2704 = vmatpush3.bf16.msra.mxu0 %v2856_v44 }
  0xa6   : > { %2705 = vmatprep.subr.bf16.mxu0 %v2904_v1 }
  0xa7   : > { %2724 = vmatpush3.bf16.msra.mxu1 %v2857_v7 }
  0xa8   : > { %2725 = vmatprep.subr.bf16.mxu1 %v2904_v1 }
  0xa9   : > { %2706 = vmatpush3.bf16.msra.mxu0 %v2858_v2 }
  0xaa   : > { %2707 = vmatprep.subr.bf16.mxu0 %v2904_v1 }
  0xab   : > { %2726 = vmatpush3.bf16.msra.mxu1 %v2859_v53 }
  0xac   : > { %2727 = vmatprep.subr.bf16.mxu1 %v2904_v1 }
  0xad   : > { %2708 = vmatpush3.bf16.msra.mxu0 %v2860_v22 }
  0xae   : > { %2709 = vmatprep.subr.bf16.mxu0 %v2904_v1 }
  0xaf   : > { %2728 = vmatpush3.bf16.msra.mxu1 %v2861_v48 }
  0xb0   : > { %2729 = vmatprep.subr.bf16.mxu1 %v2904_v1 }
  0xb1   : > { %2710 = vmatpush3.bf16.msra.mxu0 %v2862_v3 }
  0xb3   : > { %2730 = vmatpush3.bf16.msra.mxu1 %v2863_v6 }
  0xb4   : > { %2712 = vmatmul.mubr.bf16.vlgmr.msra.gmra.mxu0 %v1709_v29 }
  0xb6   : > { %2732 = vmatmul.mubr.bf16.vlgmr.msra.gmra.mxu1 %v1902_v9 }
  0xf4   : > { %v777_v34 = vpop.f32.mrf.mxu0  ;;  %v865_v47 = vpop.f32.mrf.mxu1 }
  0xf5   : > { %v866_v11 = vadd.f32 %v865_v47, %v777_v34 }
  0xf6   : > { %v2553_v28 = vpop.f32.mrf.mxu0  ;;  %v2573_v50 = vpop.f32.mrf.mxu1 }
  0xf8   : > { %v780_v14 = vpop.f32.mrf.mxu0  ;;  %v868_v16 = vpop.f32.mrf.mxu1 }
  0xfa   : > { %v2554_v62 = vpop.f32.mrf.mxu0  ;;  %v2574_v58 = vpop.f32.mrf.mxu1 }
 0x114   : > { %v979_v17 = vpop.f32.mrf.mxu0 }
 0x115   : > { %v985_v40 = vadd.f32 %v979_v17, %v866_v11 }
 0x116   : > { %v2593_v38 = vpop.f32.mrf.mxu0  ;;  %v1161_v56 = vpop.f32.mrf.mxu1 }
 0x117   : > { %v1167_v57 = vadd.f32 %v1161_v56, %v985_v40 }
 0x118   : > { %v982_v30 = vpop.f32.mrf.mxu0  ;;  %v2613_v4 = vpop.f32.mrf.mxu1 }
 0x11a   : > { %v2594_v1 = vpop.f32.mrf.mxu0  ;;  %v1164_v35 = vpop.f32.mrf.mxu1 }
 0x11c   : > { %v2614_v37 = vpop.f32.mrf.mxu1 }
 0x134   : > { %v1271_v15 = vpop.f32.mrf.mxu0 }
 0x135   : > { %v1277_v61 = vadd.f32 %v1271_v15, %v1167_v57 }
 0x136   : > { %v2633_v5 = vpop.f32.mrf.mxu0  ;;  %v1386_v18 = vpop.f32.mrf.mxu1 }
 0x137   : > { %v1392_v51 = vadd.f32 %v1386_v18, %v1277_v61 }
 0x138   : > { %v1274_v49 = vpop.f32.mrf.mxu0  ;;  %v2653_v25 = vpop.f32.mrf.mxu1 }
 0x13a   : > { %v2634_v24 = vpop.f32.mrf.mxu0  ;;  %v1389_v26 = vpop.f32.mrf.mxu1 }
 0x13c   : > { %v2654_v31 = vpop.f32.mrf.mxu1 }
 0x154   : > { %v1568_v36 = vpop.f32.mrf.mxu0 }
 0x155   : > { %v1574_v12 = vadd.f32 %v1568_v36, %v1392_v51 }
 0x156   : > { %v2673_v39 = vpop.f32.mrf.mxu0  ;;  %v1678_v46 = vpop.f32.mrf.mxu1 }
 0x157   : > { %v1684_v10 = vadd.f32 %v1678_v46, %v1574_v12 }
 0x158   : > { %v1571_v33 = vpop.f32.mrf.mxu0  ;;  %v2693_v32 = vpop.f32.mrf.mxu1 }
 0x15a   : > { %v2674_v27 = vpop.f32.mrf.mxu0  ;;  %v1681_v44 = vpop.f32.mrf.mxu1 }
 0x15c   : > { %v2694_v45 = vpop.f32.mrf.mxu1 }
 0x174   : > { %v1793_v2 = vpop.f32.mrf.mxu0 }
 0x175   : > { %v1799_v52 = vadd.f32 %v1793_v2, %v1684_v10 }
 0x176   : > { %v2713_v7 = vpop.f32.mrf.mxu0  ;;  %v2001_v54 = vpop.f32.mrf.mxu1 }
 0x177   : > { %v1807_v13 = vadd.f32 %v2412_v43, %v1799_v52 }
 0x178   : > { %v1796_v41 = vpop.f32.mrf.mxu0  ;;  %v2733_v21 = vpop.f32.mrf.mxu1 }
 0x179   : > { %v1809_v42 = vmul.f32 0.2, %v1807_v13  ;;  %vm1808_vm5 = vcmp.ge.f32.partialorder %v1807_v13, 0.0 }
 0x17a   : > { %v2714_v55 = vpop.f32.mrf.mxu0  ;;  %v2004_v60 = vpop.f32.mrf.mxu1 }
 0x17b   : > { %v1810_v22 = vsel %vm1808_vm5, %v1807_v13, %v1809_v42 }
 0x17c   : > { %v1811_v53 = vmul.f32 1.4142135, %v1810_v22  ;;  %v2734_v0 = vpop.f32.mrf.mxu1 }
 0x17e   : > { %v2007_v63 = vadd.f32 %v2001_v54, %v1811_v53 }
 0x180   : > { %v2008_v23 = vmul.f32 0.70710677, %v2007_v63 }
 0x182   : > { %2009 = vst [vmem:[%s521_s13] sm:$0xff] %v2008_v23 }
 0x183 PF: > { %s18_s9 = sadd.s32 1, %s2902_s9   ;;  %s3672_s27 = smov %s2894_s29 }
 0x184   : > { %p15_p12 = scmp.ge.s32.totalorder %s18_s9, 18   ;;  %s3673_s28 = smov %s2898_s30 }
 0x185   : > { %s3674_s29 = smov %s3677_s10  ;;  %s3675_s30 = smov %s3681_s11 }
 0x186   :  { %17 = sbr.rel (!%p15_p12) target bundleno = 3 (0x3), region = 107 }

</bundles_post_ra>
